<compile_context>
chip_gen: v7x
topology: tpu7x:2x2x1
jax: 0.10.0
libtpu: 0.0.40
codegen_flags: <defaults>
</compile_context>

<pallas_src>
import jax
import jax.numpy as jnp
import numpy as np
from jax import lax
from jax.experimental import pallas as pl
from jax.experimental.pallas import tpu as pltpu


LANE = 128   # lane width
SUB = 16     # sublane granularity used for bf16-packed blocks


def _round_up(x, m):
    return (x + m - 1) // m * m


# ----------------------------- Pallas kernels ------------------------------

def conv_relu_pool_kernel(p_ref, w_ref, b_ref, o_ref):
    """Fused conv (GEMM over im2col patches) + 2x2 max-pool + bias + ReLU.

    p_ref: (P2, tm, Kp) bf16  -- one leading slot per position in pool window
    w_ref: (Kp, Cp)     bf16
    b_ref: (1,  Cp)     f32
    o_ref: (tm, Cp)     f32
    """
    p2, tm, kp = p_ref.shape
    # Single large MXU push instead of P2 tiny (tm, Kp) x (Kp, Cp) matmuls.
    y = jnp.dot(p_ref[...].reshape(p2 * tm, kp), w_ref[...],
                preferred_element_type=jnp.float32)            # (P2*tm, Cp)
    y = jnp.max(y.reshape(p2, tm, -1), axis=0)                 # 2x2 max-pool
    # relu(max_j(dot_j) + b) == max_j(relu(dot_j + b))  (max is monotone)
    o_ref[...] = jnp.maximum(y + b_ref[...], 0.0)


def mlp_kernel(x_ref, w1_ref, b1_ref, w2_ref, b2_ref, o_ref):
    """classifier: Linear(800->512pad) + ReLU + Linear(512pad->128pad)."""
    h = jnp.dot(x_ref[...], w1_ref[...],
                preferred_element_type=jnp.float32) + b1_ref[...]
    h = jnp.maximum(h, 0.0)
    o_ref[...] = (jnp.dot(h.astype(w2_ref.dtype), w2_ref[...],
                          preferred_element_type=jnp.float32) + b2_ref[...])


# ----------------------------- pallas_call glue -----------------------------

_COMPILER_PARAMS = pltpu.CompilerParams(
    dimension_semantics=("parallel",),          # M / batch axis: 2x on v7x
    vmem_limit_bytes=32 * 1024 * 1024)          # safe on v5e/v6e/v7x


def conv_relu_pool(patches, w_mat, b_row, *, tm_max=256):
    """patches: (P2, M, Kp) bf16, w_mat: (Kp, Cp) bf16, b_row: (1, Cp) f32."""
    p2, m, kp = patches.shape
    cp = w_mat.shape[1]
    tm = min(tm_max, _round_up(m, SUB))
    m_pad = _round_up(m, tm)
    if m_pad != m:
        patches = jnp.pad(patches, ((0, 0), (0, m_pad - m), (0, 0)))
    out = pl.pallas_call(
        conv_relu_pool_kernel,
        grid=(m_pad // tm,),
        in_specs=[
            pl.BlockSpec((p2, tm, kp), lambda i: (0, i, 0)),   # stream M tiles
            pl.BlockSpec((kp, cp), lambda i: (0, 0)),          # weights resident
            pl.BlockSpec((1, cp), lambda i: (0, 0)),
        ],
        out_specs=pl.BlockSpec((tm, cp), lambda i: (i, 0)),
        out_shape=jax.ShapeDtypeStruct((m_pad, cp), jnp.float32),
        compiler_params=_COMPILER_PARAMS,
    )(patches, w_mat, b_row)
    return out[:m]


def classifier(x, w1, b1, w2, b2, *, tn_max=256):
    """x: (N, K) bf16; w1: (K, H) bf16; b1: (1,H) f32; w2: (H,O) bf16; b2: (1,O)."""
    n, k = x.shape
    h = w1.shape[1]
    o = w2.shape[1]
    tn = min(tn_max, _round_up(n, SUB))
    n_pad = _round_up(n, tn)
    if n_pad != n:
        x = jnp.pad(x, ((0, n_pad - n), (0, 0)))
    out = pl.pallas_call(
        mlp_kernel,
        grid=(n_pad // tn,),
        in_specs=[
            pl.BlockSpec((tn, k), lambda i: (i, 0)),           # stream batch tiles
            pl.BlockSpec((k, h), lambda i: (0, 0)),            # weights resident
            pl.BlockSpec((1, h), lambda i: (0, 0)),
            pl.BlockSpec((h, o), lambda i: (0, 0)),
            pl.BlockSpec((1, o), lambda i: (0, 0)),
        ],
        out_specs=pl.BlockSpec((tn, o), lambda i: (i, 0)),
        out_shape=jax.ShapeDtypeStruct((n_pad, o), jnp.float32),
        compiler_params=_COMPILER_PARAMS,
    )(x, w1, b1, w2, b2)
    return out[:n]


# --------------------------- im2col (plain JAX glue) ------------------------

def im2col_pooled(x_nhwc, ksize, pool, k_pad):
    """Returns (pool*pool, N*PH*PW, k_pad) bf16 patches, K ordered (kh, kw, ci)."""
    n, h, w, c = x_nhwc.shape
    oh, ow = h - ksize + 1, w - ksize + 1
    assert oh % pool == 0 and ow % pool == 0, "conv output must divide pool size"
    ph, pw = oh // pool, ow // pool
    per_offset = []
    for dh in range(pool):
        for dw in range(pool):
            parts = []
            for kh in range(ksize):
                for kw in range(ksize):
                    r0, c0 = dh + kh, dw + kw
                    sl = x_nhwc[:, r0:r0 + pool * (ph - 1) + 1:pool,
                                c0:c0 + pool * (pw - 1) + 1:pool, :]  # (n,ph,pw,c)
                    parts.append(sl)
            p = jnp.stack(parts, axis=3)                  # (n, ph, pw, KH*KW, c)
            per_offset.append(p.reshape(n * ph * pw, ksize * ksize * c))
    patches = jnp.stack(per_offset, axis=0)               # (P2, M, K)
    k = patches.shape[-1]
    if k_pad != k:
        patches = jnp.pad(patches, ((0, 0), (0, 0), (0, k_pad - k)))
    return patches.astype(jnp.bfloat16)


# ------------------------------- forward pass -------------------------------

def convnet_forward(x_nchw, params):
    (w1, b1, w2, b2, fw1, fb1, fw2, fb2) = params
    n = x_nchw.shape[0]

    x = jnp.transpose(x_nchw, (0, 2, 3, 1))                     # NCHW -> NHWC

    # features stage 1: Conv2d(1, 20, 5, 1) + ReLU + MaxPool2d(2, 2)
    k1, c1, k1p, c1p = 25, 20, 32, LANE
    p1 = im2col_pooled(x, 5, 2, k1p)                            # (4, N*144, 32)
    w1m = jnp.transpose(w1, (2, 3, 1, 0)).reshape(k1, c1)       # (25, 20)
    w1m = jnp.pad(w1m, ((0, k1p - k1), (0, c1p - c1))).astype(jnp.bfloat16)
    b1r = jnp.pad(b1.reshape(1, -1), ((0, 0), (0, c1p - c1)))
    y1 = conv_relu_pool(p1, w1m, b1r)[:, :c1]                   # (N*144, 20) f32
    y1 = y1.reshape(n, 12, 12, c1)

    # features stage 2: Conv2d(20, 50, 5, 1) + ReLU + MaxPool2d(2, 2)
    # TODO(synk): fuse stage 2 (and its im2col) into stage 1's epilogue so y1
    # never round-trips through HBM; at MNIST scale launch + DMA dominates.
    k2, c2, k2p, c2p = 500, 50, 512, LANE
    p2 = im2col_pooled(y1, 5, 2, k2p)                           # (4, N*16, 512)
    w2m = jnp.transpose(w2, (2, 3, 1, 0)).reshape(k2, c2)       # (500, 50)
    w2m = jnp.pad(w2m, ((0, k2p - k2), (0, c2p - c2))).astype(jnp.bfloat16)
    b2r = jnp.pad(b2.reshape(1, -1), ((0, 0), (0, c2p - c2)))
    y2 = conv_relu_pool(p2, w2m, b2r)[:, :c2]                   # (N*16, 50)

    # x.view(N, -1) in PyTorch flattens NCHW order (C, H, W):
    y2 = y2.reshape(n, 4, 4, c2).transpose(0, 3, 1, 2).reshape(n, -1)  # (N, 800)

    # classifier: Linear(800, 500) + ReLU + Linear(500, 10), lane-padded
    hid, out_d, hp, op = 500, 10, 512, LANE
    fw1p = jnp.pad(fw1.T, ((0, 0), (0, hp - hid))).astype(jnp.bfloat16)      # (800,512)
    fb1p = jnp.pad(fb1.reshape(1, -1), ((0, 0), (0, hp - hid)))
    fw2p = jnp.pad(fw2.T, ((0, hp - hid), (0, op - out_d))).astype(jnp.bfloat16)  # (512,128)
    fb2p = jnp.pad(fb2.reshape(1, -1), ((0, 0), (0, op - out_d)))
    logits = classifier(y2.astype(jnp.bfloat16), fw1p, fb1p, fw2p, fb2p)
    return logits[:, :out_d]


# --------------------------- deterministic params ---------------------------

def init_params(key):
    ks = jax.random.split(key, 8)

    def u(k, shape, fan_in):
        bound = 1.0 / np.sqrt(fan_in)
        return jax.random.uniform(k, shape, jnp.float32, -bound, bound)

    w1 = u(ks[0], (20, 1, 5, 5), 1 * 5 * 5)      # Conv2d(1, 20, 5)
    b1 = u(ks[1], (20,), 1 * 5 * 5)
    w2 = u(ks[2], (50, 20, 5, 5), 20 * 5 * 5)    # Conv2d(20, 50, 5)
    b2 = u(ks[3], (50,), 20 * 5 * 5)
    fw1 = u(ks[4], (500, 800), 800)              # Linear(800, 500)
    fb1 = u(ks[5], (500,), 800)
    fw2 = u(ks[6], (10, 500), 500)               # Linear(500, 10)
    fb2 = u(ks[7], (10,), 500)
    return (w1, b1, w2, b2, fw1, fb1, fw2, fb2)


# ------------------------- pure-JAX reference model --------------------------
# Mirrors the kernel's precision choice (bf16 MXU operands, f32 accumulate /
# elementwise) so the check is tight while matching module semantics.

def reference_forward(x_nchw, params):
    (w1, b1, w2, b2, fw1, fb1, fw2, fb2) = params
    dn = ("NCHW", "OIHW", "NCHW")

    def conv_bf16(x, w):
        return lax.conv_general_dilated(
            x.astype(jnp.bfloat16), w.astype(jnp.bfloat16), (1, 1), "VALID",
            dimension_numbers=dn, preferred_element_type=jnp.float32)

    def mm_bf16(a, b):
        return jnp.dot(a.astype(jnp.bfloat16), b.astype(jnp.bfloat16),
                       preferred_element_type=jnp.float32)

    y = conv_bf16(x_nchw, w1) + b1[None, :, None, None]
    y = jnp.maximum(y, 0.0)
    y = lax.reduce_window(y, -jnp.inf, lax.max, (1, 1, 2, 2), (1, 1, 2, 2), "VALID")
    y = conv_bf16(y, w2) + b2[None, :, None, None]
    y = jnp.maximum(y, 0.0)
    y = lax.reduce_window(y, -jnp.inf, lax.max, (1, 1, 2, 2), (1, 1, 2, 2), "VALID")
    y = y.reshape(y.shape[0], -1)
    h = jnp.maximum(mm_bf16(y, fw1.T) + fb1, 0.0)
    return mm_bf16(h, fw2.T) + fb2


# ----------------------------------- main ------------------------------------

if __name__ == "__main__":
    # TODO(synk): only the default activation_fn='relu' branch is implemented
    # (the nn.Softplus(beta) alternative is not wired into the kernels).
    key = jax.random.PRNGKey(0)
    pkey, xkey = jax.random.split(key)
    params = init_params(pkey)

    # Input shape is fixed by the classifier (4*4*50): MNIST-like NCHW.
    x = jax.random.normal(xkey, (2, 1, 28, 28), jnp.float32)

    out = jax.jit(convnet_forward)(x, params)
    out = jax.block_until_ready(out)
    assert out.shape == (2, 10)

    ref = jax.jit(reference_forward)(x, params)
    np.testing.assert_allclose(np.asarray(out), np.asarray(ref),
                               rtol=2e-3, atol=2e-3)
    print("KERNEL_OK")
</pallas_src>

<mosaic_0001>
module attributes {stable_mosaic.version = 11 : i64} {
  func.func @conv_relu_pool_kernel(%arg0: i32, %arg1: memref<4x256x32xbf16, #tpu.memory_space<vmem>>, %arg2: memref<32x128xbf16, #tpu.memory_space<vmem>>, %arg3: memref<1x128xf32, #tpu.memory_space<vmem>>, %arg4: memref<256x128xf32, #tpu.memory_space<vmem>>) attributes {dimension_semantics = [#tpu.dimension_semantics<parallel>], iteration_bounds = array<i64: 2>, scalar_prefetch = 0 : i64, scratch_operands = 0 : i64, tpu.core_type = #tpu.core_type<tc>, window_params = [{transform_indices = @transform_0, window_bounds = array<i64: 4, 256, 32>}, {pipeline_mode = #tpu.pipeline_mode<synchronous>, transform_indices = @transform_1, window_bounds = array<i64: 32, 128>}, {pipeline_mode = #tpu.pipeline_mode<synchronous>, transform_indices = @transform_2, window_bounds = array<i64: 1, 128>}, {transform_indices = @transform_3, window_bounds = array<i64: 256, 128>}]} {
    %c0 = arith.constant 0 : index
    %c0_0 = arith.constant 0 : index
    %c0_1 = arith.constant 0 : index
    %0 = vector.load %arg1[%c0, %c0_0, %c0_1] : memref<4x256x32xbf16, #tpu.memory_space<vmem>>, vector<4x256x32xbf16>
    %1 = vector.shape_cast %0 : vector<4x256x32xbf16> to vector<1024x32xbf16>
    %c0_2 = arith.constant 0 : index
    %c0_3 = arith.constant 0 : index
    %2 = vector.load %arg2[%c0_2, %c0_3] : memref<32x128xbf16, #tpu.memory_space<vmem>>, vector<32x128xbf16>
    %cst = arith.constant dense<0.000000e+00> : vector<1024x128xf32>
    %3 = tpu.matmul %1, %2, %cst {dimension_numbers = #tpu.dot_dimension_numbers<[1], [0], [0], [1], [0, 0, 1, 1], [], []>} : vector<1024x32xbf16>, vector<32x128xbf16>, vector<1024x128xf32> -> vector<1024x128xf32>
    %4 = vector.shape_cast %3 : vector<1024x128xf32> to vector<4x256x128xf32>
    %cst_4 = arith.constant dense<0xFF800000> : vector<256x128xf32>
    %5 = vector.multi_reduction <maximumf>, %4, %cst_4 [0] : vector<4x256x128xf32> to vector<256x128xf32>
    %c0_5 = arith.constant 0 : index
    %c0_6 = arith.constant 0 : index
    %6 = vector.load %arg3[%c0_5, %c0_6] : memref<1x128xf32, #tpu.memory_space<vmem>>, vector<1x128xf32>
    %7 = vector.broadcast %6 : vector<1x128xf32> to vector<256x128xf32>
    %8 = arith.addf %5, %7 : vector<256x128xf32>
    %cst_7 = arith.constant 0.000000e+00 : f32
    %9 = vector.broadcast %cst_7 : f32 to vector<256x128xf32>
    %10 = arith.maximumf %8, %9 : vector<256x128xf32>
    %c0_8 = arith.constant 0 : index
    %c0_9 = arith.constant 0 : index
    %11 = vector.load %arg4[%c0_8, %c0_9] : memref<256x128xf32, #tpu.memory_space<vmem>>, vector<256x128xf32>
    tpu.vector_store %arg4[%c0_8, %c0_9], %10 {strides = array<i32>} : memref<256x128xf32, #tpu.memory_space<vmem>>, vector<256x128xf32>,
    return
  }
  func.func @transform_0(%arg0: i32) -> (i32, i32, i32) {
    %c0_i32 = arith.constant 0 : i32
    %c0_i32_0 = arith.constant 0 : i32
    %c0_i32_1 = arith.constant 0 : i32
    return %c0_i32, %arg0, %c0_i32_0 : i32, i32, i32
  }
  func.func @transform_1(%arg0: i32) -> (i32, i32) {
    %c0_i32 = arith.constant 0 : i32
    %c0_i32_0 = arith.constant 0 : i32
    %c0_i32_1 = arith.constant 0 : i32
    return %c0_i32, %c0_i32_0 : i32, i32
  }
  func.func @transform_2(%arg0: i32) -> (i32, i32) {
    %c0_i32 = arith.constant 0 : i32
    %c0_i32_0 = arith.constant 0 : i32
    %c0_i32_1 = arith.constant 0 : i32
    return %c0_i32, %c0_i32_0 : i32, i32
  }
  func.func @transform_3(%arg0: i32) -> (i32, i32) {
    %c0_i32 = arith.constant 0 : i32
    %c0_i32_0 = arith.constant 0 : i32
    return %arg0, %c0_i32 : i32, i32
  }
}

module attributes {stable_mosaic.version = 11 : i64} {
  func.func @conv_relu_pool_kernel(%arg0: i32, %arg1: memref<4x32x512xbf16, #tpu.memory_space<vmem>>, %arg2: memref<512x128xbf16, #tpu.memory_space<vmem>>, %arg3: memref<1x128xf32, #tpu.memory_space<vmem>>, %arg4: memref<32x128xf32, #tpu.memory_space<vmem>>) attributes {dimension_semantics = [#tpu.dimension_semantics<parallel>], iteration_bounds = array<i64: 1>, scalar_prefetch = 0 : i64, scratch_operands = 0 : i64, tpu.core_type = #tpu.core_type<tc>, window_params = [{transform_indices = @transform_0, window_bounds = array<i64: 4, 32, 512>}, {pipeline_mode = #tpu.pipeline_mode<synchronous>, transform_indices = @transform_1, window_bounds = array<i64: 512, 128>}, {pipeline_mode = #tpu.pipeline_mode<synchronous>, transform_indices = @transform_2, window_bounds = array<i64: 1, 128>}, {transform_indices = @transform_3, window_bounds = array<i64: 32, 128>}]} {
    %c0 = arith.constant 0 : index
    %c0_0 = arith.constant 0 : index
    %c0_1 = arith.constant 0 : index
    %0 = vector.load %arg1[%c0, %c0_0, %c0_1] : memref<4x32x512xbf16, #tpu.memory_space<vmem>>, vector<4x32x512xbf16>
    %1 = vector.shape_cast %0 : vector<4x32x512xbf16> to vector<128x512xbf16>
    %c0_2 = arith.constant 0 : index
    %c0_3 = arith.constant 0 : index
    %2 = vector.load %arg2[%c0_2, %c0_3] : memref<512x128xbf16, #tpu.memory_space<vmem>>, vector<512x128xbf16>
    %cst = arith.constant dense<0.000000e+00> : vector<128x128xf32>
    %3 = tpu.matmul %1, %2, %cst {dimension_numbers = #tpu.dot_dimension_numbers<[1], [0], [0], [1], [0, 0, 1, 1], [], []>} : vector<128x512xbf16>, vector<512x128xbf16>, vector<128x128xf32> -> vector<128x128xf32>
    %4 = vector.shape_cast %3 : vector<128x128xf32> to vector<4x32x128xf32>
    %cst_4 = arith.constant dense<0xFF800000> : vector<32x128xf32>
    %5 = vector.multi_reduction <maximumf>, %4, %cst_4 [0] : vector<4x32x128xf32> to vector<32x128xf32>
    %c0_5 = arith.constant 0 : index
    %c0_6 = arith.constant 0 : index
    %6 = vector.load %arg3[%c0_5, %c0_6] : memref<1x128xf32, #tpu.memory_space<vmem>>, vector<1x128xf32>
    %7 = vector.broadcast %6 : vector<1x128xf32> to vector<32x128xf32>
    %8 = arith.addf %5, %7 : vector<32x128xf32>
    %cst_7 = arith.constant 0.000000e+00 : f32
    %9 = vector.broadcast %cst_7 : f32 to vector<32x128xf32>
    %10 = arith.maximumf %8, %9 : vector<32x128xf32>
    %c0_8 = arith.constant 0 : index
    %c0_9 = arith.constant 0 : index
    %11 = vector.load %arg4[%c0_8, %c0_9] : memref<32x128xf32, #tpu.memory_space<vmem>>, vector<32x128xf32>
    tpu.vector_store %arg4[%c0_8, %c0_9], %10 {strides = array<i32>} : memref<32x128xf32, #tpu.memory_space<vmem>>, vector<32x128xf32>,
    return
  }
  func.func @transform_0(%arg0: i32) -> (i32, i32, i32) {
    %c0_i32 = arith.constant 0 : i32
    %c0_i32_0 = arith.constant 0 : i32
    %c0_i32_1 = arith.constant 0 : i32
    return %c0_i32, %arg0, %c0_i32_0 : i32, i32, i32
  }
  func.func @transform_1(%arg0: i32) -> (i32, i32) {
    %c0_i32 = arith.constant 0 : i32
    %c0_i32_0 = arith.constant 0 : i32
    %c0_i32_1 = arith.constant 0 : i32
    return %c0_i32, %c0_i32_0 : i32, i32
  }
  func.func @transform_2(%arg0: i32) -> (i32, i32) {
    %c0_i32 = arith.constant 0 : i32
    %c0_i32_0 = arith.constant 0 : i32
    %c0_i32_1 = arith.constant 0 : i32
    return %c0_i32, %c0_i32_0 : i32, i32
  }
  func.func @transform_3(%arg0: i32) -> (i32, i32) {
    %c0_i32 = arith.constant 0 : i32
    %c0_i32_0 = arith.constant 0 : i32
    return %arg0, %c0_i32 : i32, i32
  }
}

module attributes {stable_mosaic.version = 11 : i64} {
  func.func @mlp_kernel(%arg0: i32, %arg1: memref<16x800xbf16, #tpu.memory_space<vmem>>, %arg2: memref<800x512xbf16, #tpu.memory_space<vmem>>, %arg3: memref<1x512xf32, #tpu.memory_space<vmem>>, %arg4: memref<512x128xbf16, #tpu.memory_space<vmem>>, %arg5: memref<1x128xf32, #tpu.memory_space<vmem>>, %arg6: memref<16x128xf32, #tpu.memory_space<vmem>>) attributes {dimension_semantics = [#tpu.dimension_semantics<parallel>], iteration_bounds = array<i64: 1>, scalar_prefetch = 0 : i64, scratch_operands = 0 : i64, tpu.core_type = #tpu.core_type<tc>, window_params = [{transform_indices = @transform_0, window_bounds = array<i64: 16, 800>}, {pipeline_mode = #tpu.pipeline_mode<synchronous>, transform_indices = @transform_1, window_bounds = array<i64: 800, 512>}, {pipeline_mode = #tpu.pipeline_mode<synchronous>, transform_indices = @transform_2, window_bounds = array<i64: 1, 512>}, {pipeline_mode = #tpu.pipeline_mode<synchronous>, transform_indices = @transform_3, window_bounds = array<i64: 512, 128>}, {pipeline_mode = #tpu.pipeline_mode<synchronous>, transform_indices = @transform_4, window_bounds = array<i64: 1, 128>}, {transform_indices = @transform_5, window_bounds = array<i64: 16, 128>}]} {
    %c0 = arith.constant 0 : index
    %c0_0 = arith.constant 0 : index
    %0 = vector.load %arg1[%c0, %c0_0] : memref<16x800xbf16, #tpu.memory_space<vmem>>, vector<16x800xbf16>
    %c0_1 = arith.constant 0 : index
    %c0_2 = arith.constant 0 : index
    %1 = vector.load %arg2[%c0_1, %c0_2] : memref<800x512xbf16, #tpu.memory_space<vmem>>, vector<800x512xbf16>
    %cst = arith.constant dense<0.000000e+00> : vector<16x512xf32>
    %2 = tpu.matmul %0, %1, %cst {dimension_numbers = #tpu.dot_dimension_numbers<[1], [0], [0], [1], [0, 0, 1, 1], [], []>} : vector<16x800xbf16>, vector<800x512xbf16>, vector<16x512xf32> -> vector<16x512xf32>
    %c0_3 = arith.constant 0 : index
    %c0_4 = arith.constant 0 : index
    %3 = vector.load %arg3[%c0_3, %c0_4] : memref<1x512xf32, #tpu.memory_space<vmem>>, vector<1x512xf32>
    %4 = vector.broadcast %3 : vector<1x512xf32> to vector<16x512xf32>
    %5 = arith.addf %2, %4 : vector<16x512xf32>
    %cst_5 = arith.constant 0.000000e+00 : f32
    %6 = vector.broadcast %cst_5 : f32 to vector<16x512xf32>
    %7 = arith.maximumf %5, %6 : vector<16x512xf32>
    %8 = arith.truncf %7 : vector<16x512xf32> to vector<16x512xbf16>
    %c0_6 = arith.constant 0 : index
    %c0_7 = arith.constant 0 : index
    %9 = vector.load %arg4[%c0_6, %c0_7] : memref<512x128xbf16, #tpu.memory_space<vmem>>, vector<512x128xbf16>
    %cst_8 = arith.constant dense<0.000000e+00> : vector<16x128xf32>
    %10 = tpu.matmul %8, %9, %cst_8 {dimension_numbers = #tpu.dot_dimension_numbers<[1], [0], [0], [1], [0, 0, 1, 1], [], []>} : vector<16x512xbf16>, vector<512x128xbf16>, vector<16x128xf32> -> vector<16x128xf32>
    %c0_9 = arith.constant 0 : index
    %c0_10 = arith.constant 0 : index
    %11 = vector.load %arg5[%c0_9, %c0_10] : memref<1x128xf32, #tpu.memory_space<vmem>>, vector<1x128xf32>
    %12 = vector.broadcast %11 : vector<1x128xf32> to vector<16x128xf32>
    %13 = arith.addf %10, %12 : vector<16x128xf32>
    %c0_11 = arith.constant 0 : index
    %c0_12 = arith.constant 0 : index
    %14 = vector.load %arg6[%c0_11, %c0_12] : memref<16x128xf32, #tpu.memory_space<vmem>>, vector<16x128xf32>
    tpu.vector_store %arg6[%c0_11, %c0_12], %13 {strides = array<i32>} : memref<16x128xf32, #tpu.memory_space<vmem>>, vector<16x128xf32>,
    return
  }
  func.func @transform_0(%arg0: i32) -> (i32, i32) {
    %c0_i32 = arith.constant 0 : i32
    %c0_i32_0 = arith.constant 0 : i32
    return %arg0, %c0_i32 : i32, i32
  }
  func.func @transform_1(%arg0: i32) -> (i32, i32) {
    %c0_i32 = arith.constant 0 : i32
    %c0_i32_0 = arith.constant 0 : i32
    %c0_i32_1 = arith.constant 0 : i32
    return %c0_i32, %c0_i32_0 : i32, i32
  }
  func.func @transform_2(%arg0: i32) -> (i32, i32) {
    %c0_i32 = arith.constant 0 : i32
    %c0_i32_0 = arith.constant 0 : i32
    %c0_i32_1 = arith.constant 0 : i32
    return %c0_i32, %c0_i32_0 : i32, i32
  }
  func.func @transform_3(%arg0: i32) -> (i32, i32) {
    %c0_i32 = arith.constant 0 : i32
    %c0_i32_0 = arith.constant 0 : i32
    %c0_i32_1 = arith.constant 0 : i32
    return %c0_i32, %c0_i32_0 : i32, i32
  }
  func.func @transform_4(%arg0: i32) -> (i32, i32) {
    %c0_i32 = arith.constant 0 : i32
    %c0_i32_0 = arith.constant 0 : i32
    %c0_i32_1 = arith.constant 0 : i32
    return %c0_i32, %c0_i32_0 : i32, i32
  }
  func.func @transform_5(%arg0: i32) -> (i32, i32) {
    %c0_i32 = arith.constant 0 : i32
    %c0_i32_0 = arith.constant 0 : i32
    return %arg0, %c0_i32 : i32, i32
  }
}

</mosaic_0001>

<bundles_post_ra>
// kernel: convnet_forward.3
= control target key start
LH: loop header
LB: loop body
LE: loop exit
PB: predicated region body
PF: predicated region fallthrough
CT: control target
= control target key end

     0   :  { %s2668_s12 = smov 0   ;;  %s2670_s13 = smov 0   ;;  %s3251_s0 = inlined_call_operand.vmem [shape: bf16[4,512,32], index: 0, kind: input, shape index: {}]   ;;  %s3252_s1 = inlined_call_operand.vmem [shape: bf16[32,128], index: 1, kind: input, shape index: {}]   ;;  %s3253_s2 = inlined_call_operand.vmem [shape: f32[1,128], index: 2, kind: input, shape index: {}]   ;;  %s3254_s3 = inlined_call_operand.vmem [shape: f32[512,128], index: 3, kind: output, shape index: {}]  }
   0x1   :  { %s2672_s14 = smov 0  }
   0x2 LB: > { %s2187_s15 = sadd.s32 4294967295, %s2646_s14   ;;  %s2685_s16 = sadd.s32 1, %s2646_s14   ;;  %s2646_s14 = sphi %s2672_s14, %s3285_s14   ;;  %s2642_s13 = sphi %s2670_s13, %s3284_s13   ;;  %s2638_s12 = sphi %s2668_s12, %s3283_s12  }
   0x3   : > { %s17_s17 = ssub.s32 %s2646_s14, %s2685_s16  ;;  %s20_s18 = sadd.s32 1, %s2642_s13 }
   0x4   : > { %p18_p0 = scmp.eq.s32.totalorder %s17_s17, 0  ;;  %p27_p1 = scmp.ne.s32.totalorder %s2642_s13, %s2638_s12 }
   0x5   : > { %p28_p2 = scmp.eq.s32.totalorder %s2646_s14, 0  ;;  %p2190_p4 = scmp.ge.s32.totalorder %s2646_s14, 2 }
   0x6   : > { %s2694_s19 = scalar_select %p18_p0, %s2642_s13, %s20_s18  }
   0x7   : > { %p29_p3 = por %p28_p2, %p27_p1  ;;  %127 = sbr.rel (%p2190_p4) target bundleno = 50 (0x32), region = 24 }
   0xe   : > { %130 = sbr.rel (!%p29_p3) target bundleno = 50 (0x32), region = 28  ;;  %s132_s20 = sand.u32 (%p29_p3), 1, %s2642_s13  }
   0xf   : > { %s2331_s21 = sshll.u32 (%p29_p3), %s2646_s14, 7  ;;  %s2191_s22 = sshll.u32 (%p29_p3), %s132_s20, 9 }
  0x10   : > { %s2702_s25 = scalar_lea.vmem (%p29_p3), %s3251_s0, %s2331_s21  ;;  %s2707_s26 = scalar_lea.vmem (%p29_p3), [#allocation2], %s2191_s22 }
  0x11   : > { %v153_v0 = vld [vmem:[%s2702_s25] sm:$0xff] (%p29_p3)   ;;  %v157_v1 = vld [vmem:[%s2702_s25 + $0x8] sm:$0xff] (%p29_p3)   ;;  %v161_v2 = vld [vmem:[%s2702_s25 + $0x10] sm:$0xff] (%p29_p3)  }
  0x12   : > { %154 = vst [vmem:[%s2707_s26] sm:$0xff] (%p29_p3), %v153_v0   ;;  %158 = vst [vmem:[%s2707_s26 + $0x8] sm:$0xff] (%p29_p3), %v157_v1   ;;  %v165_v3 = vld [vmem:[%s2702_s25 + $0x18] sm:$0xff] (%p29_p3)   ;;  %v169_v4 = vld [vmem:[%s2702_s25 + $0x20] sm:$0xff] (%p29_p3)  }
  0x13   : > { %162 = vst [vmem:[%s2707_s26 + $0x10] sm:$0xff] (%p29_p3), %v161_v2   ;;  %v173_v5 = vld [vmem:[%s2702_s25 + $0x28] sm:$0xff] (%p29_p3)   ;;  %166 = vst [vmem:[%s2707_s26 + $0x18] sm:$0xff] (%p29_p3), %v165_v3   ;;  %v177_v6 = vld [vmem:[%s2702_s25 + $0x30] sm:$0xff] (%p29_p3)  }
  0x14   : > { %170 = vst [vmem:[%s2707_s26 + $0x20] sm:$0xff] (%p29_p3), %v169_v4   ;;  %174 = vst [vmem:[%s2707_s26 + $0x28] sm:$0xff] (%p29_p3), %v173_v5   ;;  %v181_v7 = vld [vmem:[%s2702_s25 + $0x38] sm:$0xff] (%p29_p3)   ;;  %v185_v8 = vld [vmem:[%s2702_s25 + $0x40] sm:$0xff] (%p29_p3)  }
  0x15   : > { %178 = vst [vmem:[%s2707_s26 + $0x30] sm:$0xff] %v177_v6   ;;  %182 = vst [vmem:[%s2707_s26 + $0x38] sm:$0xff] %v181_v7   ;;  %v189_v9 = vld [vmem:[%s2702_s25 + $0x48] sm:$0xff]   ;;  %v193_v10 = vld [vmem:[%s2702_s25 + $0x50] sm:$0xff]  }
  0x16   : > { %186 = vst [vmem:[%s2707_s26 + $0x40] sm:$0xff] %v185_v8   ;;  %v197_v11 = vld [vmem:[%s2702_s25 + $0x58] sm:$0xff]   ;;  %190 = vst [vmem:[%s2707_s26 + $0x48] sm:$0xff] %v189_v9   ;;  %v201_v12 = vld [vmem:[%s2702_s25 + $0x60] sm:$0xff]  }
  0x17   : > { %194 = vst [vmem:[%s2707_s26 + $0x50] sm:$0xff] %v193_v10   ;;  %198 = vst [vmem:[%s2707_s26 + $0x58] sm:$0xff] %v197_v11   ;;  %v205_v13 = vld [vmem:[%s2702_s25 + $0x68] sm:$0xff]   ;;  %v209_v14 = vld [vmem:[%s2702_s25 + $0x70] sm:$0xff]  }
  0x18   : > { %202 = vst [vmem:[%s2707_s26 + $0x60] sm:$0xff] %v201_v12   ;;  %206 = vst [vmem:[%s2707_s26 + $0x68] sm:$0xff] %v205_v13   ;;  %v213_v15 = vld [vmem:[%s2702_s25 + $0x78] sm:$0xff]   ;;  %v217_v16 = vld [vmem:[%s2702_s25 + $0x100] sm:$0xff]  }
  0x19   : > { %210 = vst [vmem:[%s2707_s26 + $0x70] sm:$0xff] %v209_v14   ;;  %v221_v17 = vld [vmem:[%s2702_s25 + $0x108] sm:$0xff]   ;;  %214 = vst [vmem:[%s2707_s26 + $0x78] sm:$0xff] %v213_v15   ;;  %v225_v18 = vld [vmem:[%s2702_s25 + $0x110] sm:$0xff]  }
  0x1a   : > { %218 = vst [vmem:[%s2707_s26 + $0x80] sm:$0xff] %v217_v16   ;;  %222 = vst [vmem:[%s2707_s26 + $0x88] sm:$0xff] %v221_v17   ;;  %v229_v19 = vld [vmem:[%s2702_s25 + $0x118] sm:$0xff]   ;;  %v233_v20 = vld [vmem:[%s2702_s25 + $0x120] sm:$0xff]  }
  0x1b   : > { %226 = vst [vmem:[%s2707_s26 + $0x90] sm:$0xff] %v225_v18   ;;  %230 = vst [vmem:[%s2707_s26 + $0x98] sm:$0xff] %v229_v19   ;;  %v237_v21 = vld [vmem:[%s2702_s25 + $0x128] sm:$0xff]   ;;  %v241_v22 = vld [vmem:[%s2702_s25 + $0x130] sm:$0xff]  }
  0x1c   : > { %234 = vst [vmem:[%s2707_s26 + $0xa0] sm:$0xff] %v233_v20   ;;  %v245_v23 = vld [vmem:[%s2702_s25 + $0x138] sm:$0xff]   ;;  %238 = vst [vmem:[%s2707_s26 + $0xa8] sm:$0xff] %v237_v21   ;;  %v249_v24 = vld [vmem:[%s2702_s25 + $0x140] sm:$0xff]  }
  0x1d   : > { %242 = vst [vmem:[%s2707_s26 + $0xb0] sm:$0xff] %v241_v22   ;;  %246 = vst [vmem:[%s2707_s26 + $0xb8] sm:$0xff] %v245_v23   ;;  %v253_v25 = vld [vmem:[%s2702_s25 + $0x148] sm:$0xff]   ;;  %v257_v26 = vld [vmem:[%s2702_s25 + $0x150] sm:$0xff]  }
  0x1e   : > { %250 = vst [vmem:[%s2707_s26 + $0xc0] sm:$0xff] %v249_v24   ;;  %254 = vst [vmem:[%s2707_s26 + $0xc8] sm:$0xff] %v253_v25   ;;  %v261_v27 = vld [vmem:[%s2702_s25 + $0x158] sm:$0xff]   ;;  %v265_v28 = vld [vmem:[%s2702_s25 + $0x160] sm:$0xff]  }
  0x1f   : > { %258 = vst [vmem:[%s2707_s26 + $0xd0] sm:$0xff] %v257_v26   ;;  %v269_v29 = vld [vmem:[%s2702_s25 + $0x168] sm:$0xff]   ;;  %262 = vst [vmem:[%s2707_s26 + $0xd8] sm:$0xff] %v261_v27   ;;  %v273_v30 = vld [vmem:[%s2702_s25 + $0x170] sm:$0xff]  }
  0x20   : > { %266 = vst [vmem:[%s2707_s26 + $0xe0] sm:$0xff] %v265_v28   ;;  %270 = vst [vmem:[%s2707_s26 + $0xe8] sm:$0xff] %v269_v29   ;;  %v277_v31 = vld [vmem:[%s2702_s25 + $0x178] sm:$0xff]   ;;  %v281_v32 = vld [vmem:[%s2702_s25 + $0x200] sm:$0xff]  }
  0x21   : > { %274 = vst [vmem:[%s2707_s26 + $0xf0] sm:$0xff] %v273_v30   ;;  %278 = vst [vmem:[%s2707_s26 + $0xf8] sm:$0xff] %v277_v31   ;;  %v285_v33 = vld [vmem:[%s2702_s25 + $0x208] sm:$0xff]   ;;  %v289_v34 = vld [vmem:[%s2702_s25 + $0x210] sm:$0xff]  }
  0x22   : > { %282 = vst [vmem:[%s2707_s26 + $0x100] sm:$0xff] %v281_v32   ;;  %v293_v35 = vld [vmem:[%s2702_s25 + $0x218] sm:$0xff]   ;;  %286 = vst [vmem:[%s2707_s26 + $0x108] sm:$0xff] %v285_v33   ;;  %v297_v36 = vld [vmem:[%s2702_s25 + $0x220] sm:$0xff]  }
  0x23   : > { %290 = vst [vmem:[%s2707_s26 + $0x110] sm:$0xff] %v289_v34   ;;  %294 = vst [vmem:[%s2707_s26 + $0x118] sm:$0xff] %v293_v35   ;;  %v301_v37 = vld [vmem:[%s2702_s25 + $0x228] sm:$0xff]   ;;  %v305_v38 = vld [vmem:[%s2702_s25 + $0x230] sm:$0xff]  }
  0x24   : > { %298 = vst [vmem:[%s2707_s26 + $0x120] sm:$0xff] %v297_v36   ;;  %302 = vst [vmem:[%s2707_s26 + $0x128] sm:$0xff] %v301_v37   ;;  %v309_v39 = vld [vmem:[%s2702_s25 + $0x238] sm:$0xff]   ;;  %v313_v40 = vld [vmem:[%s2702_s25 + $0x240] sm:$0xff]  }
  0x25   : > { %306 = vst [vmem:[%s2707_s26 + $0x130] sm:$0xff] %v305_v38   ;;  %v317_v41 = vld [vmem:[%s2702_s25 + $0x248] sm:$0xff]   ;;  %310 = vst [vmem:[%s2707_s26 + $0x138] sm:$0xff] %v309_v39   ;;  %v321_v42 = vld [vmem:[%s2702_s25 + $0x250] sm:$0xff]  }
  0x26   : > { %314 = vst [vmem:[%s2707_s26 + $0x140] sm:$0xff] %v313_v40   ;;  %318 = vst [vmem:[%s2707_s26 + $0x148] sm:$0xff] %v317_v41   ;;  %v325_v43 = vld [vmem:[%s2702_s25 + $0x258] sm:$0xff]   ;;  %v329_v44 = vld [vmem:[%s2702_s25 + $0x260] sm:$0xff]  }
  0x27   : > { %322 = vst [vmem:[%s2707_s26 + $0x150] sm:$0xff] %v321_v42   ;;  %326 = vst [vmem:[%s2707_s26 + $0x158] sm:$0xff] %v325_v43   ;;  %v333_v45 = vld [vmem:[%s2702_s25 + $0x268] sm:$0xff]   ;;  %v337_v46 = vld [vmem:[%s2702_s25 + $0x270] sm:$0xff]  }
  0x28   : > { %330 = vst [vmem:[%s2707_s26 + $0x160] sm:$0xff] %v329_v44   ;;  %v341_v47 = vld [vmem:[%s2702_s25 + $0x278] sm:$0xff]   ;;  %334 = vst [vmem:[%s2707_s26 + $0x168] sm:$0xff] %v333_v45   ;;  %v345_v48 = vld [vmem:[%s2702_s25 + $0x300] sm:$0xff]  }
  0x29   : > { %338 = vst [vmem:[%s2707_s26 + $0x170] sm:$0xff] %v337_v46   ;;  %342 = vst [vmem:[%s2707_s26 + $0x178] sm:$0xff] %v341_v47   ;;  %v349_v49 = vld [vmem:[%s2702_s25 + $0x308] sm:$0xff]   ;;  %v353_v50 = vld [vmem:[%s2702_s25 + $0x310] sm:$0xff]  }
  0x2a   : > { %346 = vst [vmem:[%s2707_s26 + $0x180] sm:$0xff] %v345_v48   ;;  %350 = vst [vmem:[%s2707_s26 + $0x188] sm:$0xff] %v349_v49   ;;  %v357_v51 = vld [vmem:[%s2702_s25 + $0x318] sm:$0xff]   ;;  %v361_v52 = vld [vmem:[%s2702_s25 + $0x320] sm:$0xff]  }
  0x2b   : > { %354 = vst [vmem:[%s2707_s26 + $0x190] sm:$0xff] %v353_v50   ;;  %v365_v53 = vld [vmem:[%s2702_s25 + $0x328] sm:$0xff]   ;;  %358 = vst [vmem:[%s2707_s26 + $0x198] sm:$0xff] %v357_v51   ;;  %v369_v54 = vld [vmem:[%s2702_s25 + $0x330] sm:$0xff]  }
  0x2c   : > { %362 = vst [vmem:[%s2707_s26 + $0x1a0] sm:$0xff] %v361_v52   ;;  %366 = vst [vmem:[%s2707_s26 + $0x1a8] sm:$0xff] %v365_v53   ;;  %v373_v55 = vld [vmem:[%s2702_s25 + $0x338] sm:$0xff]   ;;  %v377_v56 = vld [vmem:[%s2702_s25 + $0x340] sm:$0xff]  }
  0x2d   : > { %370 = vst [vmem:[%s2707_s26 + $0x1b0] sm:$0xff] %v369_v54   ;;  %374 = vst [vmem:[%s2707_s26 + $0x1b8] sm:$0xff] %v373_v55   ;;  %v381_v57 = vld [vmem:[%s2702_s25 + $0x348] sm:$0xff]   ;;  %v385_v58 = vld [vmem:[%s2702_s25 + $0x350] sm:$0xff]  }
  0x2e   : > { %378 = vst [vmem:[%s2707_s26 + $0x1c0] sm:$0xff] %v377_v56   ;;  %v389_v59 = vld [vmem:[%s2702_s25 + $0x358] sm:$0xff]   ;;  %382 = vst [vmem:[%s2707_s26 + $0x1c8] sm:$0xff] %v381_v57   ;;  %v393_v60 = vld [vmem:[%s2702_s25 + $0x360] sm:$0xff]  }
  0x2f   : > { %386 = vst [vmem:[%s2707_s26 + $0x1d0] sm:$0xff] %v385_v58   ;;  %390 = vst [vmem:[%s2707_s26 + $0x1d8] sm:$0xff] %v389_v59   ;;  %v397_v61 = vld [vmem:[%s2702_s25 + $0x368] sm:$0xff]   ;;  %v401_v62 = vld [vmem:[%s2702_s25 + $0x370] sm:$0xff]  }
  0x30   : > { %394 = vst [vmem:[%s2707_s26 + $0x1e0] sm:$0xff] %v393_v60   ;;  %398 = vst [vmem:[%s2707_s26 + $0x1e8] sm:$0xff] %v397_v61   ;;  %v405_v63 = vld [vmem:[%s2702_s25 + $0x378] sm:$0xff]  }
  0x31   : > { %402 = vst [vmem:[%s2707_s26 + $0x1f0] sm:$0xff] %v401_v62   ;;  %406 = vst [vmem:[%s2707_s26 + $0x1f8] sm:$0xff] %v405_v63  }
  0x32 PF: > { %p2194_p5 = scmp.ge.s32.totalorder %s2646_s14, 1  ;;  %p686_p6 = scmp.lt.s32.totalorder %s2646_s14, 3 }
  0x34   : > { %p687_p7 = pnand %p2194_p5, %p686_p6 }
  0x36   : > { %690 = sbr.rel (%p687_p7) target bundleno = 416 (0x1a0), region = 69 }
  0x3d   : > { %v2558_v0 = vld [vmem:[%s3252_s1] sm:$0xff]   ;;  %s693_s29 = sand.u32 1, %s2638_s12   ;;  %v2559_v1 = vld [vmem:[%s3252_s1 + $0x8] sm:$0xff]   ;;  %vm1188_vm0 = vcmask 261120   ;;  %s2196_s7 = sshll.u32 %s2187_s15, 5 }
  0x3e   : > { %s2195_s5 = sshll.u32 %s693_s29, 9  ;;  %2398 = vmatprep.subr.bf16.mxu0 %v2558_v0  ;;  %2530 = vmatprep.subr.bf16.mxu1 %v2558_v0  ;;  %p718_p8 = scmp.lt.s32.totalorder %s2196_s7, 63 }
  0x3f   : > { %2399 = vmatpush3.bf16.msra.mxu0 %v2558_v0  ;;  %2532 = vmatpush3.bf16.msra.mxu1 %v2558_v0  ;;  %s2843_s6 = scalar_lea.vmem [#allocation2], %s2195_s5 }
  0x40   : > { %v2560_v2 = vld [vmem:[%s2843_s6] sm:$0xff]   ;;  %2400 = vmatprep.subr.bf16.mxu0 %v2559_v1  ;;  %2531 = vmatprep.subr.bf16.mxu1 %v2559_v1  ;;  %v2561_v3 = vld [vmem:[%s2843_s6 + $0x8] sm:$0xff]   ;;  %v2564_v6 = vld [vmem:[%s2843_s6 + $0x10] sm:$0xff]   ;;  %s3287_s7 = smov (!%p718_p8, %s2196_s7), 63 }
  0x41   : > { %2402 = vmatprep.mubr.msk.bf16.mxu0 %vm1188_vm0, %v2560_v2  ;;  %v2562_v4 = vld [vmem:[%s2843_s6 + $0x100] sm:$0xff]   ;;  %v2563_v5 = vld [vmem:[%s2843_s6 + $0x108] sm:$0xff]   ;;  %v2566_v7 = vld [vmem:[%s2843_s6 + $0x110] sm:$0xff]   ;;  %s2197_s10 = sshll.u32 %s3287_s7, 3 }
  0x42   : > { %2466 = vmatprep.mubr.msk.bf16.mxu1 %vm1188_vm0, %v2562_v4  ;;  %v2565_v8 = vld [vmem:[%s2843_s6 + $0x18] sm:$0xff]   ;;  %v2568_v10 = vld [vmem:[%s2843_s6 + $0x20] sm:$0xff]   ;;  %v2569_v12 = vld [vmem:[%s2843_s6 + $0x28] sm:$0xff]   ;;  %s3120_s14 = scalar_lea.vmem %s3254_s3, %s2197_s10 }
  0x43   : > { %2401 = vmatpush3.bf16.msra.mxu0 %v2559_v1  ;;  %2533 = vmatpush3.bf16.msra.mxu1 %v2559_v1  ;;  %v2567_v9 = vld [vmem:[%s2843_s6 + $0x118] sm:$0xff]   ;;  %v2570_v11 = vld [vmem:[%s2843_s6 + $0x120] sm:$0xff]   ;;  %v2571_v13 = vld [vmem:[%s2843_s6 + $0x128] sm:$0xff]  }
  0x44   : > { %v2572_v14 = vld [vmem:[%s2843_s6 + $0x30] sm:$0xff]   ;;  %v2573_v16 = vld [vmem:[%s2843_s6 + $0x38] sm:$0xff]   ;;  %v2576_v18 = vld [vmem:[%s2843_s6 + $0x40] sm:$0xff]  }
  0x45   : > { %v2574_v15 = vld [vmem:[%s2843_s6 + $0x130] sm:$0xff]   ;;  %v2575_v17 = vld [vmem:[%s2843_s6 + $0x138] sm:$0xff]   ;;  %v2578_v19 = vld [vmem:[%s2843_s6 + $0x140] sm:$0xff]  }
  0x46   : > { %2403 = vmatmul.mubr.msk.bf16.vlgmr.msra.gmra.mrb[0].mxu0 %vm1188_vm0, %v2561_v3  ;;  %2467 = vmatmul.mubr.msk.bf16.vlgmr.msra.gmra.mrb[0].mxu1 %vm1188_vm0, %v2563_v5  ;;  %v2577_v20 = vld [vmem:[%s2843_s6 + $0x48] sm:$0xff]   ;;  %v2580_v22 = vld [vmem:[%s2843_s6 + $0x50] sm:$0xff]   ;;  %v2581_v24 = vld [vmem:[%s2843_s6 + $0x58] sm:$0xff]  }
  0x47   : > { %2406 = vmatprep.mubr.msk.bf16.mxu0 %vm1188_vm0, %v2564_v6  ;;  %2470 = vmatprep.mubr.msk.bf16.mxu1 %vm1188_vm0, %v2566_v7  ;;  %v2579_v21 = vld [vmem:[%s2843_s6 + $0x148] sm:$0xff]   ;;  %v2582_v23 = vld [vmem:[%s2843_s6 + $0x150] sm:$0xff]   ;;  %v2583_v25 = vld [vmem:[%s2843_s6 + $0x158] sm:$0xff]  }
  0x48   : > { %v2584_v26 = vld [vmem:[%s2843_s6 + $0x60] sm:$0xff]   ;;  %v2585_v28 = vld [vmem:[%s2843_s6 + $0x68] sm:$0xff]   ;;  %v2588_v30 = vld [vmem:[%s2843_s6 + $0x70] sm:$0xff]  }
  0x49   : > { %v2586_v27 = vld [vmem:[%s2843_s6 + $0x160] sm:$0xff]   ;;  %v2587_v29 = vld [vmem:[%s2843_s6 + $0x168] sm:$0xff]   ;;  %v2590_v31 = vld [vmem:[%s2843_s6 + $0x170] sm:$0xff]  }
  0x4a   : > { %v2589_v32 = vld [vmem:[%s2843_s6 + $0x78] sm:$0xff]   ;;  %v2592_v34 = vld [vmem:[%s2843_s6 + $0x80] sm:$0xff]   ;;  %v2593_v36 = vld [vmem:[%s2843_s6 + $0x88] sm:$0xff]  }
  0x4b   : > { %v2591_v33 = vld [vmem:[%s2843_s6 + $0x178] sm:$0xff]   ;;  %v2594_v35 = vld [vmem:[%s2843_s6 + $0x180] sm:$0xff]   ;;  %v2595_v37 = vld [vmem:[%s2843_s6 + $0x188] sm:$0xff]  }
  0x4c   : > { %v2596_v38 = vld [vmem:[%s2843_s6 + $0x90] sm:$0xff]   ;;  %v2597_v40 = vld [vmem:[%s2843_s6 + $0x98] sm:$0xff]   ;;  %v2600_v42 = vld [vmem:[%s2843_s6 + $0xa0] sm:$0xff]  }
  0x4d   : > { %v2598_v39 = vld [vmem:[%s2843_s6 + $0x190] sm:$0xff]   ;;  %v2599_v41 = vld [vmem:[%s2843_s6 + $0x198] sm:$0xff]   ;;  %v2602_v43 = vld [vmem:[%s2843_s6 + $0x1a0] sm:$0xff]  }
  0x4e   : > { %2407 = vmatmul.mubr.msk.bf16.gmra.mrb[4].mxu0 %vm1188_vm0, %v2565_v8  ;;  %2471 = vmatmul.mubr.msk.bf16.gmra.mrb[4].mxu1 %vm1188_vm0, %v2567_v9  ;;  %v2601_v44 = vld [vmem:[%s2843_s6 + $0xa8] sm:$0xff]   ;;  %v2604_v46 = vld [vmem:[%s2843_s6 + $0xb0] sm:$0xff]   ;;  %v2605_v48 = vld [vmem:[%s2843_s6 + $0xb8] sm:$0xff]  }
  0x4f   : > { %2410 = vmatprep.mubr.msk.bf16.mxu0 %vm1188_vm0, %v2568_v10  ;;  %2474 = vmatprep.mubr.msk.bf16.mxu1 %vm1188_vm0, %v2570_v11  ;;  %v2603_v45 = vld [vmem:[%s2843_s6 + $0x1a8] sm:$0xff]   ;;  %v2606_v47 = vld [vmem:[%s2843_s6 + $0x1b0] sm:$0xff]   ;;  %v2607_v49 = vld [vmem:[%s2843_s6 + $0x1b8] sm:$0xff]  }
  0x50   : > { %v2608_v50 = vld [vmem:[%s2843_s6 + $0xc0] sm:$0xff]   ;;  %v2609_v52 = vld [vmem:[%s2843_s6 + $0xc8] sm:$0xff]   ;;  %v2612_v54 = vld [vmem:[%s2843_s6 + $0xd0] sm:$0xff]  }
  0x51   : > { %v2610_v51 = vld [vmem:[%s2843_s6 + $0x1c0] sm:$0xff]   ;;  %v2611_v53 = vld [vmem:[%s2843_s6 + $0x1c8] sm:$0xff]   ;;  %v2614_v55 = vld [vmem:[%s2843_s6 + $0x1d0] sm:$0xff]  }
  0x52   : > { %v2613_v56 = vld [vmem:[%s2843_s6 + $0xd8] sm:$0xff]   ;;  %v2616_v58 = vld [vmem:[%s2843_s6 + $0xe0] sm:$0xff]   ;;  %v2617_v60 = vld [vmem:[%s2843_s6 + $0xe8] sm:$0xff]  }
  0x53   : > { %v2615_v57 = vld [vmem:[%s2843_s6 + $0x1d8] sm:$0xff]   ;;  %v2618_v59 = vld [vmem:[%s2843_s6 + $0x1e0] sm:$0xff]   ;;  %v2619_v61 = vld [vmem:[%s2843_s6 + $0x1e8] sm:$0xff]  }
  0x54   : > { %v2620_v62 = vld [vmem:[%s2843_s6 + $0xf0] sm:$0xff]   ;;  %v2621_v0 = vld [vmem:[%s2843_s6 + $0xf8] sm:$0xff]  }
  0x55   : > { %v2622_v63 = vld [vmem:[%s2843_s6 + $0x1f0] sm:$0xff]   ;;  %v2623_v1 = vld [vmem:[%s2843_s6 + $0x1f8] sm:$0xff]  }
  0x56   : > { %2411 = vmatmul.mubr.msk.bf16.gmra.mrb[8].mxu0 %vm1188_vm0, %v2569_v12  ;;  %2475 = vmatmul.mubr.msk.bf16.gmra.mrb[8].mxu1 %vm1188_vm0, %v2571_v13 }
  0x57   : > { %2414 = vmatprep.mubr.msk.bf16.mxu0 %vm1188_vm0, %v2572_v14  ;;  %2478 = vmatprep.mubr.msk.bf16.mxu1 %vm1188_vm0, %v2574_v15 }
  0x5e   : > { %2415 = vmatmul.mubr.msk.bf16.gmra.mrb[12].mxu0 %vm1188_vm0, %v2573_v16  ;;  %2479 = vmatmul.mubr.msk.bf16.gmra.mrb[12].mxu1 %vm1188_vm0, %v2575_v17 }
  0x5f   : > { %2418 = vmatprep.mubr.msk.bf16.mxu0 %vm1188_vm0, %v2576_v18  ;;  %2482 = vmatprep.mubr.msk.bf16.mxu1 %vm1188_vm0, %v2578_v19 }
  0x66   : > { %2419 = vmatmul.mubr.msk.bf16.gmra.mrb[16].mxu0 %vm1188_vm0, %v2577_v20  ;;  %2483 = vmatmul.mubr.msk.bf16.gmra.mrb[16].mxu1 %vm1188_vm0, %v2579_v21 }
  0x67   : > { %2422 = vmatprep.mubr.msk.bf16.mxu0 %vm1188_vm0, %v2580_v22  ;;  %2486 = vmatprep.mubr.msk.bf16.mxu1 %vm1188_vm0, %v2582_v23 }
  0x6e   : > { %2423 = vmatmul.mubr.msk.bf16.gmra.mrb[20].mxu0 %vm1188_vm0, %v2581_v24  ;;  %2487 = vmatmul.mubr.msk.bf16.gmra.mrb[20].mxu1 %vm1188_vm0, %v2583_v25 }
  0x6f   : > { %2426 = vmatprep.mubr.msk.bf16.mxu0 %vm1188_vm0, %v2584_v26  ;;  %2490 = vmatprep.mubr.msk.bf16.mxu1 %vm1188_vm0, %v2586_v27 }
  0x76   : > { %2427 = vmatmul.mubr.msk.bf16.gmra.mrb[24].mxu0 %vm1188_vm0, %v2585_v28  ;;  %2491 = vmatmul.mubr.msk.bf16.gmra.mrb[24].mxu1 %vm1188_vm0, %v2587_v29 }
  0x77   : > { %2430 = vmatprep.mubr.msk.bf16.mxu0 %vm1188_vm0, %v2588_v30  ;;  %2494 = vmatprep.mubr.msk.bf16.mxu1 %vm1188_vm0, %v2590_v31 }
  0x7e   : > { %2431 = vmatmul.mubr.msk.bf16.gmra.mrb[28].mxu0 %vm1188_vm0, %v2589_v32  ;;  %2495 = vmatmul.mubr.msk.bf16.gmra.mrb[28].mxu1 %vm1188_vm0, %v2591_v33 }
  0x7f   : > { %2434 = vmatprep.mubr.msk.bf16.mxu0 %vm1188_vm0, %v2592_v34  ;;  %2498 = vmatprep.mubr.msk.bf16.mxu1 %vm1188_vm0, %v2594_v35 }
  0x86   : > { %2435 = vmatmul.mubr.msk.bf16.gmra.mrb[32].mxu0 %vm1188_vm0, %v2593_v36  ;;  %2499 = vmatmul.mubr.msk.bf16.gmra.mrb[32].mxu1 %vm1188_vm0, %v2595_v37 }
  0x87   : > { %2438 = vmatprep.mubr.msk.bf16.mxu0 %vm1188_vm0, %v2596_v38  ;;  %2502 = vmatprep.mubr.msk.bf16.mxu1 %vm1188_vm0, %v2598_v39 }
  0x8e   : > { %2439 = vmatmul.mubr.msk.bf16.gmra.mrb[36].mxu0 %vm1188_vm0, %v2597_v40  ;;  %2503 = vmatmul.mubr.msk.bf16.gmra.mrb[36].mxu1 %vm1188_vm0, %v2599_v41 }
  0x8f   : > { %2442 = vmatprep.mubr.msk.bf16.mxu0 %vm1188_vm0, %v2600_v42  ;;  %2506 = vmatprep.mubr.msk.bf16.mxu1 %vm1188_vm0, %v2602_v43 }
  0x96   : > { %2443 = vmatmul.mubr.msk.bf16.gmra.mrb[40].mxu0 %vm1188_vm0, %v2601_v44  ;;  %2507 = vmatmul.mubr.msk.bf16.gmra.mrb[40].mxu1 %vm1188_vm0, %v2603_v45 }
  0x97   : > { %2446 = vmatprep.mubr.msk.bf16.mxu0 %vm1188_vm0, %v2604_v46  ;;  %2510 = vmatprep.mubr.msk.bf16.mxu1 %vm1188_vm0, %v2606_v47 }
  0x9e   : > { %2447 = vmatmul.mubr.msk.bf16.gmra.mrb[44].mxu0 %vm1188_vm0, %v2605_v48  ;;  %2511 = vmatmul.mubr.msk.bf16.gmra.mrb[44].mxu1 %vm1188_vm0, %v2607_v49 }
  0x9f   : > { %2450 = vmatprep.mubr.msk.bf16.mxu0 %vm1188_vm0, %v2608_v50  ;;  %2514 = vmatprep.mubr.msk.bf16.mxu1 %vm1188_vm0, %v2610_v51 }
  0xa6   : > { %2451 = vmatmul.mubr.msk.bf16.gmra.mrb[48].mxu0 %vm1188_vm0, %v2609_v52  ;;  %2515 = vmatmul.mubr.msk.bf16.gmra.mrb[48].mxu1 %vm1188_vm0, %v2611_v53 }
  0xa7   : > { %2454 = vmatprep.mubr.msk.bf16.mxu0 %vm1188_vm0, %v2612_v54  ;;  %2518 = vmatprep.mubr.msk.bf16.mxu1 %vm1188_vm0, %v2614_v55 }
  0xae   : > { %2455 = vmatmul.mubr.msk.bf16.gmra.mrb[52].mxu0 %vm1188_vm0, %v2613_v56  ;;  %2519 = vmatmul.mubr.msk.bf16.gmra.mrb[52].mxu1 %vm1188_vm0, %v2615_v57 }
  0xaf   : > { %2458 = vmatprep.mubr.msk.bf16.mxu0 %vm1188_vm0, %v2616_v58  ;;  %2522 = vmatprep.mubr.msk.bf16.mxu1 %vm1188_vm0, %v2618_v59 }
  0xb6   : > { %2459 = vmatmul.mubr.msk.bf16.gmra.mrb[56].mxu0 %vm1188_vm0, %v2617_v60  ;;  %2523 = vmatmul.mubr.msk.bf16.gmra.mrb[56].mxu1 %vm1188_vm0, %v2619_v61 }
  0xb7   : > { %2462 = vmatprep.mubr.msk.bf16.mxu0 %vm1188_vm0, %v2620_v62  ;;  %2526 = vmatprep.mubr.msk.bf16.mxu1 %vm1188_vm0, %v2622_v63 }
  0xbe   : > { %2463 = vmatmul.mubr.msk.bf16.gmra.mrb[60].mxu0 %vm1188_vm0, %v2621_v0  ;;  %2527 = vmatmul.mubr.msk.bf16.gmra.mrb[60].mxu1 %vm1188_vm0, %v2623_v1 }
 0x119   : > { %v2973_v2 = vpop.f32.mrb[0].mxu0  ;;  %v2975_v3 = vpop.f32.mrb[0].mxu1 }
 0x11a   : > { %v2977_v4 = vpop.f32.mrb[1].mxu0  ;;  %v2979_v5 = vpop.f32.mrb[1].mxu1 }
 0x11b   : > { %v2981_v6 = vpop.f32.mrb[2].mxu0  ;;  %v2983_v7 = vpop.f32.mrb[2].mxu1 }
 0x11c   : > { %v2985_v8 = vpop.f32.mrb[3].mxu0  ;;  %v2987_v9 = vpop.f32.mrb[3].mxu1 }
 0x121   : > { %v2989_v10 = vpop.f32.mrb[4].mxu0  ;;  %v2991_v11 = vpop.f32.mrb[4].mxu1 }
 0x122   : > { %v2993_v12 = vpop.f32.mrb[5].mxu0  ;;  %v2995_v13 = vpop.f32.mrb[5].mxu1 }
 0x123   : > { %v2997_v14 = vpop.f32.mrb[6].mxu0  ;;  %v2999_v15 = vpop.f32.mrb[6].mxu1 }
 0x124   : > { %v3001_v16 = vpop.f32.mrb[7].mxu0  ;;  %v3003_v17 = vpop.f32.mrb[7].mxu1 }
 0x129   : > { %v3005_v18 = vpop.f32.mrb[8].mxu0  ;;  %v3007_v19 = vpop.f32.mrb[8].mxu1 }
 0x12a   : > { %v3009_v20 = vpop.f32.mrb[9].mxu0  ;;  %v3011_v21 = vpop.f32.mrb[9].mxu1 }
 0x12b   : > { %v3013_v22 = vpop.f32.mrb[10].mxu0  ;;  %v3015_v23 = vpop.f32.mrb[10].mxu1 }
 0x12c   : > { %v3017_v24 = vpop.f32.mrb[11].mxu0  ;;  %v3019_v25 = vpop.f32.mrb[11].mxu1 }
 0x131   : > { %v3021_v26 = vpop.f32.mrb[12].mxu0  ;;  %v3023_v27 = vpop.f32.mrb[12].mxu1 }
 0x132   : > { %v3025_v28 = vpop.f32.mrb[13].mxu0  ;;  %v3027_v29 = vpop.f32.mrb[13].mxu1 }
 0x133   : > { %v3029_v30 = vpop.f32.mrb[14].mxu0  ;;  %v3031_v31 = vpop.f32.mrb[14].mxu1 }
 0x134   : > { %v3033_v32 = vpop.f32.mrb[15].mxu0  ;;  %v3035_v33 = vpop.f32.mrb[15].mxu1 }
 0x139   : > { %v3037_v34 = vpop.f32.mrb[16].mxu0  ;;  %v3039_v35 = vpop.f32.mrb[16].mxu1 }
 0x13a   : > { %v3041_v36 = vpop.f32.mrb[17].mxu0  ;;  %v3043_v37 = vpop.f32.mrb[17].mxu1 }
 0x13b   : > { %v3045_v38 = vpop.f32.mrb[18].mxu0  ;;  %v3047_v39 = vpop.f32.mrb[18].mxu1 }
 0x13c   : > { %v3049_v40 = vpop.f32.mrb[19].mxu0  ;;  %v3051_v41 = vpop.f32.mrb[19].mxu1 }
 0x141   : > { %v3053_v42 = vpop.f32.mrb[20].mxu0  ;;  %v3055_v43 = vpop.f32.mrb[20].mxu1 }
 0x142   : > { %v3057_v44 = vpop.f32.mrb[21].mxu0  ;;  %v3059_v45 = vpop.f32.mrb[21].mxu1 }
 0x143   : > { %v3061_v46 = vpop.f32.mrb[22].mxu0  ;;  %v3063_v47 = vpop.f32.mrb[22].mxu1 }
 0x144   : > { %v3065_v48 = vpop.f32.mrb[23].mxu0  ;;  %v3067_v49 = vpop.f32.mrb[23].mxu1 }
 0x149   : > { %v3069_v50 = vpop.f32.mrb[24].mxu0  ;;  %v3071_v51 = vpop.f32.mrb[24].mxu1 }
 0x14a   : > { %3255 = vst [vmem:[#allocation3_spill] sm:$0xff] %v3071_v51  ;;  %v3073_v52 = vpop.f32.mrb[25].mxu0  ;;  %v3075_v53 = vpop.f32.mrb[25].mxu1 }
 0x14b   : > { %3256 = vst [vmem:[#allocation4_spill] sm:$0xff] %v3075_v53  ;;  %v3077_v54 = vpop.f32.mrb[26].mxu0  ;;  %v3079_v55 = vpop.f32.mrb[26].mxu1 }
 0x14c   : > { %3257 = vst [vmem:[#allocation5_spill] sm:$0xff] %v3077_v54  ;;  %3258 = vst [vmem:[#allocation6_spill] sm:$0xff] %v3079_v55  ;;  %v3081_v56 = vpop.f32.mrb[27].mxu0  ;;  %v3083_v57 = vpop.f32.mrb[27].mxu1 }
 0x14d   : > { %3259 = vst [vmem:[#allocation7_spill] sm:$0xff] %v3081_v56  ;;  %3260 = vst [vmem:[#allocation8_spill] sm:$0xff] %v3083_v57 }
 0x151   : > { %v3085_v58 = vpop.f32.mrb[28].mxu0  ;;  %v3087_v59 = vpop.f32.mrb[28].mxu1 }
 0x152   : > { %3261 = vst [vmem:[#allocation9_spill] sm:$0xff] %v3085_v58  ;;  %3262 = vst [vmem:[#allocation10_spill] sm:$0xff] %v3087_v59  ;;  %v3089_v60 = vpop.f32.mrb[29].mxu0  ;;  %v3091_v61 = vpop.f32.mrb[29].mxu1 }
 0x153   : > { %3263 = vst [vmem:[#allocation11_spill] sm:$0xff] %v3089_v60  ;;  %3264 = vst [vmem:[#allocation12_spill] sm:$0xff] %v3091_v61  ;;  %v3093_v62 = vpop.f32.mrb[30].mxu0  ;;  %v3095_v63 = vpop.f32.mrb[30].mxu1 }
 0x154   : > { %3265 = vst [vmem:[#allocation13_spill] sm:$0xff] %v3093_v62  ;;  %3266 = vst [vmem:[#allocation14_spill] sm:$0xff] %v3095_v63  ;;  %v3099_v0 = vpop.f32.mrb[31].mxu0  ;;  %v3101_v1 = vpop.f32.mrb[31].mxu1 }
 0x155   : > { %3267 = vst [vmem:[#allocation15_spill] sm:$0xff] %v3099_v0  ;;  %3268 = vst [vmem:[#allocation16_spill] sm:$0xff] %v3101_v1  ;;  %v3110_v1 = vld [vmem:[%s3253_s2] ss:$0 sm:$0xff] }
 0x159   : > { %v2436_v57 = vpop.f32.mrb[32].mxu0  ;;  %v2500_v55 = vpop.f32.mrb[32].mxu1 }
 0x15a   : > { %v1932_v58 = vmax.f32 %v2973_v2, %v2436_v57  ;;  %v1543_v59 = vpop.f32.mrb[33].mxu0  ;;  %v1799_v60 = vpop.f32.mrb[33].mxu1 }
 0x15b   : > { %v1926_v61 = vmax.f32 %v2977_v4, %v1543_v59  ;;  %v2437_v56 = vpop.f32.mrb[34].mxu0  ;;  %v2501_v62 = vpop.f32.mrb[34].mxu1 }
 0x15c   : > { %v1933_v63 = vmax.f32 %v1932_v58, %v2975_v3  ;;  %v1935_v53 = vmax.f32 %v2981_v6, %v2437_v56  ;;  %v1546_v54 = vpop.f32.mrb[35].mxu0  ;;  %v1802_v0 = vpop.f32.mrb[35].mxu1 }
 0x15d   : > { %v1927_v2 = vmax.f32 %v1926_v61, %v2979_v5  ;;  %v1929_v57 = vmax.f32 %v2985_v8, %v1546_v54 }
 0x15e   : > { %v1934_v51 = vmax.f32 %v1933_v63, %v2500_v55  ;;  %v1936_v4 = vmax.f32 %v1935_v53, %v2983_v7 }
 0x15f   : > { %v1928_v59 = vmax.f32 %v1927_v2, %v1799_v60  ;;  %v1930_v3 = vmax.f32 %v1929_v57, %v2987_v9 }
 0x160   : > { %v2031_v6 = vadd.f32 %v3110_v1, %v1934_v51  ;;  %v1937_v56 = vmax.f32 %v1936_v4, %v2501_v62 }
 0x161   : > { %v2029_v5 = vadd.f32 %v3110_v1, %v1928_v59  ;;  %v1931_v58 = vmax.f32 %v1930_v3, %v1802_v0  ;;  %v2440_v8 = vpop.f32.mrb[36].mxu0  ;;  %v2504_v54 = vpop.f32.mrb[36].mxu1 }
 0x162   : > { %v2063_v55 = vmax.f32 %v2031_v6, 0.0  ;;  %v2032_v7 = vadd.f32 %v3110_v1, %v1937_v56  ;;  %v1944_v9 = vmax.f32 %v2989_v10, %v2440_v8  ;;  %v1559_v53 = vpop.f32.mrb[37].mxu0  ;;  %v1815_v51 = vpop.f32.mrb[37].mxu1 }
 0x163   : > { %v2061_v60 = vmax.f32 %v2029_v5, 0.0  ;;  %v2030_v61 = vadd.f32 %v3110_v1, %v1931_v58  ;;  %v1938_v62 = vmax.f32 %v2993_v12, %v1559_v53  ;;  %v2441_v63 = vpop.f32.mrb[38].mxu0  ;;  %v2505_v2 = vpop.f32.mrb[38].mxu1 }
 0x164   : > { %2095 = vst [vmem:[%s3120_s14 + $0x10] sm:$0xff] %v2063_v55  ;;  %v2064_v0 = vmax.f32 %v2032_v7, 0.0  ;;  %v1945_v57 = vmax.f32 %v1944_v9, %v2991_v11  ;;  %v1947_v4 = vmax.f32 %v2997_v14, %v2441_v63  ;;  %v1562_v59 = vpop.f32.mrb[39].mxu0  ;;  %v1818_v3 = vpop.f32.mrb[39].mxu1 }
 0x165   : > { %2093 = vst [vmem:[%s3120_s14] sm:$0xff] %v2061_v60  ;;  %v2062_v10 = vmax.f32 %v2030_v61, 0.0  ;;  %v1939_v6 = vmax.f32 %v1938_v62, %v2995_v13  ;;  %v1941_v56 = vmax.f32 %v3001_v16, %v1562_v59 }
 0x166   : > { %2096 = vst [vmem:[%s3120_s14 + $0x18] sm:$0xff] %v2064_v0  ;;  %v1946_v5 = vmax.f32 %v1945_v57, %v2504_v54  ;;  %v1948_v12 = vmax.f32 %v1947_v4, %v2999_v15 }
 0x167   : > { %2094 = vst [vmem:[%s3120_s14 + $0x8] sm:$0xff] %v2062_v10  ;;  %v1940_v58 = vmax.f32 %v1939_v6, %v1815_v51  ;;  %v1942_v8 = vmax.f32 %v1941_v56, %v3003_v17 }
 0x168   : > { %v2035_v11 = vadd.f32 %v3110_v1, %v1946_v5  ;;  %v1949_v14 = vmax.f32 %v1948_v12, %v2505_v2 }
 0x169   : > { %v2033_v55 = vadd.f32 %v3110_v1, %v1940_v58  ;;  %v1943_v7 = vmax.f32 %v1942_v8, %v1818_v3  ;;  %v2444_v9 = vpop.f32.mrb[40].mxu0  ;;  %v2508_v53 = vpop.f32.mrb[40].mxu1 }
 0x16a   : > { %v2067_v13 = vmax.f32 %v2035_v11, 0.0  ;;  %v2036_v16 = vadd.f32 %v3110_v1, %v1949_v14  ;;  %v1956_v54 = vmax.f32 %v3005_v18, %v2444_v9  ;;  %v1575_v15 = vpop.f32.mrb[41].mxu0  ;;  %v1831_v60 = vpop.f32.mrb[41].mxu1 }
 0x16b   : > { %v2065_v51 = vmax.f32 %v2033_v55, 0.0  ;;  %v2034_v17 = vadd.f32 %v3110_v1, %v1943_v7  ;;  %v1950_v61 = vmax.f32 %v3009_v20, %v1575_v15  ;;  %v2445_v62 = vpop.f32.mrb[42].mxu0  ;;  %v2509_v63 = vpop.f32.mrb[42].mxu1 }
 0x16c   : > { %2099 = vst [vmem:[%s3120_s14 + $0x30] sm:$0xff] %v2067_v13  ;;  %v2068_v2 = vmax.f32 %v2036_v16, 0.0  ;;  %v1957_v0 = vmax.f32 %v1956_v54, %v3007_v19  ;;  %v1959_v57 = vmax.f32 %v3013_v22, %v2445_v62  ;;  %v1578_v4 = vpop.f32.mrb[43].mxu0  ;;  %v1834_v59 = vpop.f32.mrb[43].mxu1 }
 0x16d   : > { %2097 = vst [vmem:[%s3120_s14 + $0x20] sm:$0xff] %v2065_v51  ;;  %v2066_v18 = vmax.f32 %v2034_v17, 0.0  ;;  %v1951_v3 = vmax.f32 %v1950_v61, %v3011_v21  ;;  %v1953_v10 = vmax.f32 %v3017_v24, %v1578_v4 }
 0x16e   : > { %2100 = vst [vmem:[%s3120_s14 + $0x38] sm:$0xff] %v2068_v2  ;;  %v1958_v6 = vmax.f32 %v1957_v0, %v2508_v53  ;;  %v1960_v20 = vmax.f32 %v1959_v57, %v3015_v23 }
 0x16f   : > { %2098 = vst [vmem:[%s3120_s14 + $0x28] sm:$0xff] %v2066_v18  ;;  %v1952_v56 = vmax.f32 %v1951_v3, %v1831_v60  ;;  %v1954_v5 = vmax.f32 %v1953_v10, %v3019_v25 }
 0x170   : > { %v2039_v19 = vadd.f32 %v3110_v1, %v1958_v6  ;;  %v1961_v22 = vmax.f32 %v1960_v20, %v2509_v63 }
 0x171   : > { %v2037_v12 = vadd.f32 %v3110_v1, %v1952_v56  ;;  %v1955_v58 = vmax.f32 %v1954_v5, %v1834_v59  ;;  %v2448_v8 = vpop.f32.mrb[44].mxu0  ;;  %v2512_v11 = vpop.f32.mrb[44].mxu1 }
 0x172   : > { %v2071_v21 = vmax.f32 %v2039_v19, 0.0  ;;  %v2040_v24 = vadd.f32 %v3110_v1, %v1961_v22  ;;  %v1968_v14 = vmax.f32 %v3021_v26, %v2448_v8  ;;  %v1591_v23 = vpop.f32.mrb[45].mxu0  ;;  %v1847_v55 = vpop.f32.mrb[45].mxu1 }
 0x173   : > { %v2069_v7 = vmax.f32 %v2037_v12, 0.0  ;;  %v2038_v25 = vadd.f32 %v3110_v1, %v1955_v58  ;;  %v1962_v9 = vmax.f32 %v3025_v28, %v1591_v23  ;;  %v2449_v53 = vpop.f32.mrb[46].mxu0  ;;  %v2513_v13 = vpop.f32.mrb[46].mxu1 }
 0x174   : > { %2103 = vst [vmem:[%s3120_s14 + $0x50] sm:$0xff] %v2071_v21  ;;  %v2072_v16 = vmax.f32 %v2040_v24, 0.0  ;;  %v1969_v54 = vmax.f32 %v1968_v14, %v3023_v27  ;;  %v1971_v15 = vmax.f32 %v3029_v30, %v2449_v53  ;;  %v1594_v60 = vpop.f32.mrb[47].mxu0  ;;  %v1850_v51 = vpop.f32.mrb[47].mxu1 }
 0x175   : > { %2101 = vst [vmem:[%s3120_s14 + $0x40] sm:$0xff] %v2069_v7  ;;  %v2070_v26 = vmax.f32 %v2038_v25, 0.0  ;;  %v1963_v17 = vmax.f32 %v1962_v9, %v3027_v29  ;;  %v1965_v61 = vmax.f32 %v3033_v32, %v1594_v60 }
 0x176   : > { %2104 = vst [vmem:[%s3120_s14 + $0x58] sm:$0xff] %v2072_v16  ;;  %v1970_v62 = vmax.f32 %v1969_v54, %v2512_v11  ;;  %v1972_v28 = vmax.f32 %v1971_v15, %v3031_v31 }
 0x177   : > { %2102 = vst [vmem:[%s3120_s14 + $0x48] sm:$0xff] %v2070_v26  ;;  %v1964_v63 = vmax.f32 %v1963_v17, %v1847_v55  ;;  %v1966_v2 = vmax.f32 %v1965_v61, %v3035_v33 }
 0x178   : > { %v2043_v27 = vadd.f32 %v3110_v1, %v1970_v62  ;;  %v1973_v30 = vmax.f32 %v1972_v28, %v2513_v13 }
 0x179   : > { %v2041_v0 = vadd.f32 %v3110_v1, %v1964_v63  ;;  %v1967_v57 = vmax.f32 %v1966_v2, %v1850_v51  ;;  %v2452_v4 = vpop.f32.mrb[48].mxu0  ;;  %v2516_v59 = vpop.f32.mrb[48].mxu1 }
 0x17a   : > { %v2075_v29 = vmax.f32 %v2043_v27, 0.0  ;;  %v2044_v32 = vadd.f32 %v3110_v1, %v1973_v30  ;;  %v1980_v18 = vmax.f32 %v3037_v34, %v2452_v4  ;;  %v1607_v31 = vpop.f32.mrb[49].mxu0  ;;  %v1863_v3 = vpop.f32.mrb[49].mxu1 }
 0x17b   : > { %v2073_v10 = vmax.f32 %v2041_v0, 0.0  ;;  %v2042_v33 = vadd.f32 %v3110_v1, %v1967_v57  ;;  %v1974_v6 = vmax.f32 %v3041_v36, %v1607_v31  ;;  %v2453_v20 = vpop.f32.mrb[50].mxu0  ;;  %v2517_v56 = vpop.f32.mrb[50].mxu1 }
 0x17c   : > { %2107 = vst [vmem:[%s3120_s14 + $0x70] sm:$0xff] %v2075_v29  ;;  %v2076_v5 = vmax.f32 %v2044_v32, 0.0  ;;  %v1981_v19 = vmax.f32 %v1980_v18, %v3039_v35  ;;  %v1983_v22 = vmax.f32 %v3045_v38, %v2453_v20  ;;  %v1610_v12 = vpop.f32.mrb[51].mxu0  ;;  %v1866_v58 = vpop.f32.mrb[51].mxu1  ;;  %v3270_v20 = vld [vmem:[#allocation5_spill] sm:$0xff] }
 0x17d   : > { %2105 = vst [vmem:[%s3120_s14 + $0x60] sm:$0xff] %v2073_v10  ;;  %v2074_v34 = vmax.f32 %v2042_v33, 0.0  ;;  %v1975_v8 = vmax.f32 %v1974_v6, %v3043_v37  ;;  %v1977_v11 = vmax.f32 %v3049_v40, %v1610_v12  ;;  %v3269_v33 = vld [vmem:[#allocation3_spill] sm:$0xff] }
 0x17e   : > { %2108 = vst [vmem:[%s3120_s14 + $0x78] sm:$0xff] %v2076_v5  ;;  %v1982_v21 = vmax.f32 %v1981_v19, %v2516_v59  ;;  %v1984_v36 = vmax.f32 %v1983_v22, %v3047_v39  ;;  %v3271_v22 = vld [vmem:[#allocation4_spill] sm:$0xff] }
 0x17f   : > { %2106 = vst [vmem:[%s3120_s14 + $0x68] sm:$0xff] %v2074_v34  ;;  %v1976_v24 = vmax.f32 %v1975_v8, %v1863_v3  ;;  %v1978_v14 = vmax.f32 %v1977_v11, %v3051_v41 }
 0x180   : > { %v2047_v35 = vadd.f32 %v3110_v1, %v1982_v21  ;;  %v1985_v38 = vmax.f32 %v1984_v36, %v2517_v56  ;;  %v3274_v36 = vld [vmem:[#allocation8_spill] sm:$0xff] }
 0x181   : > { %v2045_v23 = vadd.f32 %v3110_v1, %v1976_v24  ;;  %v1979_v55 = vmax.f32 %v1978_v14, %v1866_v58  ;;  %v2456_v7 = vpop.f32.mrb[52].mxu0  ;;  %v2520_v25 = vpop.f32.mrb[52].mxu1  ;;  %v3272_v58 = vld [vmem:[#allocation7_spill] sm:$0xff] }
 0x182   : > { %v2079_v37 = vmax.f32 %v2047_v35, 0.0  ;;  %v2048_v40 = vadd.f32 %v3110_v1, %v1985_v38  ;;  %v1992_v9 = vmax.f32 %v3053_v42, %v2456_v7  ;;  %v1623_v39 = vpop.f32.mrb[53].mxu0  ;;  %v1879_v53 = vpop.f32.mrb[53].mxu1 }
 0x183   : > { %v2077_v13 = vmax.f32 %v2045_v23, 0.0  ;;  %v2046_v41 = vadd.f32 %v3110_v1, %v1979_v55  ;;  %v1986_v16 = vmax.f32 %v3057_v44, %v1623_v39  ;;  %v2457_v54 = vpop.f32.mrb[54].mxu0  ;;  %v2521_v15 = vpop.f32.mrb[54].mxu1 }
 0x184   : > { %2111 = vst [vmem:[%s3120_s14 + $0x90] sm:$0xff] %v2079_v37  ;;  %v2080_v60 = vmax.f32 %v2048_v40, 0.0  ;;  %v1993_v51 = vmax.f32 %v1992_v9, %v3055_v43  ;;  %v1995_v26 = vmax.f32 %v3061_v46, %v2457_v54  ;;  %v1626_v17 = vpop.f32.mrb[55].mxu0  ;;  %v1882_v61 = vpop.f32.mrb[55].mxu1  ;;  %v3275_v40 = vld [vmem:[#allocation9_spill] sm:$0xff] }
 0x185   : > { %2109 = vst [vmem:[%s3120_s14 + $0x80] sm:$0xff] %v2077_v13  ;;  %v2078_v42 = vmax.f32 %v2046_v41, 0.0  ;;  %v1987_v62 = vmax.f32 %v1986_v16, %v3059_v45  ;;  %v1989_v28 = vmax.f32 %v3065_v48, %v1626_v17  ;;  %v3276_v16 = vld [vmem:[#allocation11_spill] sm:$0xff] }
 0x186   : > { %2112 = vst [vmem:[%s3120_s14 + $0x98] sm:$0xff] %v2080_v60  ;;  %v1994_v63 = vmax.f32 %v1993_v51, %v2520_v25  ;;  %v1996_v44 = vmax.f32 %v1995_v26, %v3063_v47  ;;  %v3277_v26 = vld [vmem:[#allocation10_spill] sm:$0xff] }
 0x187   : > { %2110 = vst [vmem:[%s3120_s14 + $0x88] sm:$0xff] %v2078_v42  ;;  %v1988_v2 = vmax.f32 %v1987_v62, %v1879_v53  ;;  %v1990_v27 = vmax.f32 %v1989_v28, %v3067_v49 }
 0x188   : > { %v2051_v43 = vadd.f32 %v3110_v1, %v1994_v63  ;;  %v1997_v46 = vmax.f32 %v1996_v44, %v2521_v15  ;;  %v3279_v44 = vld [vmem:[#allocation12_spill] sm:$0xff] }
 0x189   : > { %v2049_v30 = vadd.f32 %v3110_v1, %v1988_v2  ;;  %v1991_v0 = vmax.f32 %v1990_v27, %v1882_v61  ;;  %v2460_v57 = vpop.f32.mrb[56].mxu0  ;;  %v2524_v4 = vpop.f32.mrb[56].mxu1  ;;  %v3278_v61 = vld [vmem:[#allocation13_spill] sm:$0xff]  ;;  %v3280_v27 = vld [vmem:[#allocation15_spill] sm:$0xff] }
 0x18a   : > { %v2083_v45 = vmax.f32 %v2051_v43, 0.0  ;;  %v2052_v48 = vadd.f32 %v3110_v1, %v1997_v46  ;;  %v2004_v59 = vmax.f32 %v3069_v50, %v2460_v57  ;;  %v1639_v47 = vpop.f32.mrb[57].mxu0  ;;  %v1895_v29 = vpop.f32.mrb[57].mxu1 }
 0x18b   : > { %v2081_v32 = vmax.f32 %v2049_v30, 0.0  ;;  %v2050_v49 = vadd.f32 %v3110_v1, %v1991_v0  ;;  %v1998_v18 = vmax.f32 %v3073_v52, %v1639_v47  ;;  %v2461_v31 = vpop.f32.mrb[58].mxu0  ;;  %v2525_v3 = vpop.f32.mrb[58].mxu1  ;;  %v3273_v52 = vld [vmem:[#allocation6_spill] sm:$0xff] }
 0x18c   : > { %2115 = vst [vmem:[%s3120_s14 + $0xb0] sm:$0xff] %v2083_v45  ;;  %v2084_v10 = vmax.f32 %v2052_v48, 0.0  ;;  %v2005_v6 = vmax.f32 %v2004_v59, %v3269_v33  ;;  %v2007_v56 = vmax.f32 %v3270_v20, %v2461_v31  ;;  %v1642_v5 = vpop.f32.mrb[59].mxu0  ;;  %v1898_v19 = vpop.f32.mrb[59].mxu1  ;;  %v3281_v30 = vld [vmem:[#allocation14_spill] sm:$0xff] }
 0x18d   : > { %2113 = vst [vmem:[%s3120_s14 + $0xa0] sm:$0xff] %v2081_v32  ;;  %v2082_v50 = vmax.f32 %v2050_v49, 0.0  ;;  %v1999_v12 = vmax.f32 %v1998_v18, %v3271_v22  ;;  %v2001_v34 = vmax.f32 %v3272_v58, %v1642_v5 }
 0x18e   : > { %2116 = vst [vmem:[%s3120_s14 + $0xb8] sm:$0xff] %v2084_v10  ;;  %v2006_v8 = vmax.f32 %v2005_v6, %v2524_v4  ;;  %v2008_v11 = vmax.f32 %v2007_v56, %v3273_v52  ;;  %v3282_v4 = vld [vmem:[#allocation16_spill] sm:$0xff] }
 0x18f   : > { %2114 = vst [vmem:[%s3120_s14 + $0xa8] sm:$0xff] %v2082_v50  ;;  %v2000_v21 = vmax.f32 %v1999_v12, %v1895_v29  ;;  %v2002_v24 = vmax.f32 %v2001_v34, %v3274_v36 }
 0x190   : > { %v2055_v14 = vadd.f32 %v3110_v1, %v2006_v8  ;;  %v2009_v35 = vmax.f32 %v2008_v11, %v2525_v3 }
 0x191   : > { %v2053_v38 = vadd.f32 %v3110_v1, %v2000_v21  ;;  %v2003_v23 = vmax.f32 %v2002_v24, %v1898_v19  ;;  %v2464_v55 = vpop.f32.mrb[60].mxu0  ;;  %v2528_v7 = vpop.f32.mrb[60].mxu1 }
 0x192   : > { %v2087_v25 = vmax.f32 %v2055_v14, 0.0  ;;  %v2056_v37 = vadd.f32 %v3110_v1, %v2009_v35  ;;  %v2016_v9 = vmax.f32 %v3275_v40, %v2464_v55  ;;  %v1655_v39 = vpop.f32.mrb[61].mxu0  ;;  %v1911_v53 = vpop.f32.mrb[61].mxu1 }
 0x193   : > { %v2085_v13 = vmax.f32 %v2053_v38, 0.0  ;;  %v2054_v41 = vadd.f32 %v3110_v1, %v2003_v23  ;;  %v2010_v54 = vmax.f32 %v3276_v16, %v1655_v39  ;;  %v2465_v15 = vpop.f32.mrb[62].mxu0  ;;  %v2529_v60 = vpop.f32.mrb[62].mxu1 }
 0x194   : > { %2119 = vst [vmem:[%s3120_s14 + $0xd0] sm:$0xff] %v2087_v25  ;;  %v2088_v51 = vmax.f32 %v2056_v37, 0.0  ;;  %v2017_v17 = vmax.f32 %v2016_v9, %v3277_v26  ;;  %v2019_v42 = vmax.f32 %v3278_v61, %v2465_v15  ;;  %v1658_v62 = vpop.f32.mrb[63].mxu0  ;;  %v1914_v28 = vpop.f32.mrb[63].mxu1 }
 0x195   : > { %2117 = vst [vmem:[%s3120_s14 + $0xc0] sm:$0xff] %v2085_v13  ;;  %v2086_v63 = vmax.f32 %v2054_v41, 0.0  ;;  %v2011_v2 = vmax.f32 %v2010_v54, %v3279_v44  ;;  %v2013_v43 = vmax.f32 %v3280_v27, %v1658_v62 }
 0x196   : > { %2120 = vst [vmem:[%s3120_s14 + $0xd8] sm:$0xff] %v2088_v51  ;;  %v2018_v46 = vmax.f32 %v2017_v17, %v2528_v7  ;;  %v2020_v0 = vmax.f32 %v2019_v42, %v3281_v30 }
 0x197   : > { %2118 = vst [vmem:[%s3120_s14 + $0xc8] sm:$0xff] %v2086_v63  ;;  %v2012_v57 = vmax.f32 %v2011_v2, %v1911_v53  ;;  %v2014_v45 = vmax.f32 %v2013_v43, %v3282_v4 }
 0x198   : > { %v2059_v48 = vadd.f32 %v3110_v1, %v2018_v46  ;;  %v2021_v59 = vmax.f32 %v2020_v0, %v2529_v60 }
 0x199   : > { %v2057_v47 = vadd.f32 %v3110_v1, %v2012_v57  ;;  %v2015_v29 = vmax.f32 %v2014_v45, %v1914_v28 }
 0x19a   : > { %v2091_v32 = vmax.f32 %v2059_v48, 0.0  ;;  %v2060_v49 = vadd.f32 %v3110_v1, %v2021_v59 }
 0x19b   : > { %v2089_v18 = vmax.f32 %v2057_v47, 0.0  ;;  %v2058_v31 = vadd.f32 %v3110_v1, %v2015_v29 }
 0x19c   : > { %2123 = vst [vmem:[%s3120_s14 + $0xf0] sm:$0xff] %v2091_v32  ;;  %v2092_v3 = vmax.f32 %v2060_v49, 0.0 }
 0x19d   : > { %2121 = vst [vmem:[%s3120_s14 + $0xe0] sm:$0xff] %v2089_v18  ;;  %v2090_v10 = vmax.f32 %v2058_v31, 0.0 }
 0x19e   : > { %2124 = vst [vmem:[%s3120_s14 + $0xf8] sm:$0xff] %v2092_v3 }
 0x19f   : > { %2122 = vst [vmem:[%s3120_s14 + $0xe8] sm:$0xff] %v2090_v10 }
 0x1a0 PF: > { %p10_p9 = scmp.ge.s32.totalorder %s2685_s16, 4   ;;  %s3283_s12 = smov %s2642_s13 }
 0x1a1   : > { %s3284_s13 = smov %s2694_s19  ;;  %s3285_s14 = smov %s2685_s16 }
 0x1a2   :  { %12 = sbr.rel (!%p10_p9) target bundleno = 2 (0x2), region = 108 }

// kernel: convnet_forward.4
= control target key start
LH: loop header
LB: loop body
LE: loop exit
PB: predicated region body
PF: predicated region fallthrough
CT: control target
= control target key end

     0   :  { %s1204_s1 = inlined_call_operand.vmem [shape: bf16[512,128], index: 1, kind: input, shape index: {}]   ;;  %s1205_s0 = inlined_call_operand.vmem [shape: bf16[4,32,512], index: 0, kind: input, shape index: {}]   ;;  %s1206_s2 = inlined_call_operand.vmem [shape: f32[1,128], index: 2, kind: input, shape index: {}]   ;;  %s1207_s3 = inlined_call_operand.vmem [shape: f32[32,128], index: 3, kind: output, shape index: {}]  }
   0x1   :  { %v885_v0 = vld [vmem:[%s1204_s1 + $0x40] sm:$0xff]   ;;  %v889_v4 = vld [vmem:[%s1204_s1 + $0x48] sm:$0xff]   ;;  %v893_v8 = vld [vmem:[%s1204_s1 + $0x50] sm:$0xff]  }
   0x2   :  { %v886_v1 = vld [vmem:[%s1204_s1 + $0xc0] sm:$0xff]   ;;  %757 = vmatprep.subr.bf16.mxu0 %v885_v0  ;;  %v890_v5 = vld [vmem:[%s1204_s1 + $0xc8] sm:$0xff]   ;;  %v894_v9 = vld [vmem:[%s1204_s1 + $0xd0] sm:$0xff]  }
   0x3   :  { %v887_v2 = vld [vmem:[%s1204_s1] sm:$0xff]   ;;  %821 = vmatprep.subr.bf16.mxu1 %v886_v1  ;;  %v891_v6 = vld [vmem:[%s1204_s1 + $0x8] sm:$0xff]   ;;  %v895_v10 = vld [vmem:[%s1204_s1 + $0x10] sm:$0xff]  }
   0x4   :  { %v888_v3 = vld [vmem:[%s1204_s1 + $0x80] sm:$0xff]   ;;  %758 = vmatpush3.bf16.msra.mxu0 %v887_v2  ;;  %v892_v7 = vld [vmem:[%s1204_s1 + $0x88] sm:$0xff]   ;;  %v896_v11 = vld [vmem:[%s1204_s1 + $0x90] sm:$0xff]  }
   0x5   :  { %822 = vmatpush3.bf16.msra.mxu1 %v888_v3  ;;  %759 = vmatprep.subr.bf16.mxu0 %v889_v4  ;;  %v897_v12 = vld [vmem:[%s1204_s1 + $0x58] sm:$0xff]   ;;  %v901_v16 = vld [vmem:[%s1204_s1 + $0x60] sm:$0xff]   ;;  %v905_v20 = vld [vmem:[%s1204_s1 + $0x68] sm:$0xff]  }
   0x6   :  { %823 = vmatprep.subr.bf16.mxu1 %v890_v5  ;;  %v898_v13 = vld [vmem:[%s1204_s1 + $0xd8] sm:$0xff]   ;;  %v902_v17 = vld [vmem:[%s1204_s1 + $0xe0] sm:$0xff]   ;;  %v906_v21 = vld [vmem:[%s1204_s1 + $0xe8] sm:$0xff]  }
   0x7   :  { %v899_v14 = vld [vmem:[%s1204_s1 + $0x18] sm:$0xff]   ;;  %v903_v18 = vld [vmem:[%s1204_s1 + $0x20] sm:$0xff]   ;;  %v907_v22 = vld [vmem:[%s1204_s1 + $0x28] sm:$0xff]  }
   0x8   :  { %760 = vmatpush3.bf16.msra.mxu0 %v891_v6  ;;  %v900_v15 = vld [vmem:[%s1204_s1 + $0x98] sm:$0xff]   ;;  %v904_v19 = vld [vmem:[%s1204_s1 + $0xa0] sm:$0xff]   ;;  %v908_v23 = vld [vmem:[%s1204_s1 + $0xa8] sm:$0xff]  }
   0x9   :  { %824 = vmatpush3.bf16.msra.mxu1 %v892_v7  ;;  %761 = vmatprep.subr.bf16.mxu0 %v893_v8  ;;  %v909_v24 = vld [vmem:[%s1204_s1 + $0x70] sm:$0xff]   ;;  %v913_v28 = vld [vmem:[%s1204_s1 + $0x78] sm:$0xff]  }
   0xa   :  { %825 = vmatprep.subr.bf16.mxu1 %v894_v9  ;;  %v910_v25 = vld [vmem:[%s1204_s1 + $0xf0] sm:$0xff]   ;;  %v914_v29 = vld [vmem:[%s1204_s1 + $0xf8] sm:$0xff]  }
   0xb   :  { %v911_v26 = vld [vmem:[%s1204_s1 + $0x30] sm:$0xff]   ;;  %v915_v30 = vld [vmem:[%s1204_s1 + $0x38] sm:$0xff]  }
   0xc   :  { %762 = vmatpush3.bf16.msra.mxu0 %v895_v10  ;;  %v912_v27 = vld [vmem:[%s1204_s1 + $0xb0] sm:$0xff]   ;;  %v916_v31 = vld [vmem:[%s1204_s1 + $0xb8] sm:$0xff]  }
   0xd   :  { %826 = vmatpush3.bf16.msra.mxu1 %v896_v11  ;;  %763 = vmatprep.subr.bf16.mxu0 %v897_v12  ;;  %v917_v32 = vld [vmem:[%s1205_s0] ss:$16 sps:$4 sm:$0xff]   ;;  %v919_v33 = vld [vmem:[%s1205_s0 + $0x4] ss:$16 sps:$4 sm:$0xff]   ;;  %v920_v34 = vld [vmem:[%s1205_s0 + $0x8] ss:$16 sps:$4 sm:$0xff]  }
   0xe   :  { %827 = vmatprep.subr.bf16.mxu1 %v898_v13  ;;  %v922_v35 = vld [vmem:[%s1205_s0 + $0xc] ss:$16 sps:$4 sm:$0xff]   ;;  %495 = vmatprep.mubr.bf16.mxu0 %v919_v33  ;;  %v923_v36 = vld [vmem:[%s1205_s0 + $0x24] ss:$16 sps:$4 sm:$0xff]   ;;  %v927_v38 = vld [vmem:[%s1205_s0 + $0x20] ss:$16 sps:$4 sm:$0xff]  }
   0xf   :  { %592 = vmatprep.mubr.bf16.mxu1 %v922_v35  ;;  %v925_v37 = vld [vmem:[%s1205_s0 + $0x2c] ss:$16 sps:$4 sm:$0xff]   ;;  %v928_v39 = vld [vmem:[%s1205_s0 + $0x28] ss:$16 sps:$4 sm:$0xff]   ;;  %v929_v40 = vld [vmem:[%s1205_s0 + $0x44] ss:$16 sps:$4 sm:$0xff]  }
  0x10   :  { %764 = vmatpush3.bf16.msra.mxu0 %v899_v14  ;;  %v931_v41 = vld [vmem:[%s1205_s0 + $0x4c] ss:$16 sps:$4 sm:$0xff]   ;;  %v933_v42 = vld [vmem:[%s1205_s0 + $0x40] ss:$16 sps:$4 sm:$0xff]   ;;  %v934_v43 = vld [vmem:[%s1205_s0 + $0x48] ss:$16 sps:$4 sm:$0xff]  }
  0x11   :  { %828 = vmatpush3.bf16.msra.mxu1 %v900_v15  ;;  %765 = vmatprep.subr.bf16.mxu0 %v901_v16  ;;  %v935_v44 = vld [vmem:[%s1205_s0 + $0x64] ss:$16 sps:$4 sm:$0xff]   ;;  %v937_v45 = vld [vmem:[%s1205_s0 + $0x6c] ss:$16 sps:$4 sm:$0xff]   ;;  %v939_v46 = vld [vmem:[%s1205_s0 + $0x60] ss:$16 sps:$4 sm:$0xff]  }
  0x12   :  { %829 = vmatprep.subr.bf16.mxu1 %v902_v17  ;;  %v940_v47 = vld [vmem:[%s1205_s0 + $0x68] ss:$16 sps:$4 sm:$0xff]   ;;  %v941_v48 = vld [vmem:[%s1205_s0 + $0x84] ss:$16 sps:$4 sm:$0xff]   ;;  %v943_v49 = vld [vmem:[%s1205_s0 + $0x8c] ss:$16 sps:$4 sm:$0xff]  }
  0x13   :  { %v945_v50 = vld [vmem:[%s1205_s0 + $0x80] ss:$16 sps:$4 sm:$0xff]   ;;  %v946_v51 = vld [vmem:[%s1205_s0 + $0x88] ss:$16 sps:$4 sm:$0xff]   ;;  %v947_v52 = vld [vmem:[%s1205_s0 + $0xa4] ss:$16 sps:$4 sm:$0xff]  }
  0x14   :  { %766 = vmatpush3.bf16.msra.mxu0 %v903_v18  ;;  %v949_v53 = vld [vmem:[%s1205_s0 + $0xac] ss:$16 sps:$4 sm:$0xff]   ;;  %v951_v54 = vld [vmem:[%s1205_s0 + $0xa0] ss:$16 sps:$4 sm:$0xff]   ;;  %v952_v55 = vld [vmem:[%s1205_s0 + $0xa8] ss:$16 sps:$4 sm:$0xff]  }
  0x15   :  { %830 = vmatpush3.bf16.msra.mxu1 %v904_v19  ;;  %767 = vmatprep.subr.bf16.mxu0 %v905_v20  ;;  %v953_v56 = vld [vmem:[%s1205_s0 + $0xc4] ss:$16 sps:$4 sm:$0xff]   ;;  %v955_v57 = vld [vmem:[%s1205_s0 + $0xcc] ss:$16 sps:$4 sm:$0xff]   ;;  %v957_v58 = vld [vmem:[%s1205_s0 + $0xc0] ss:$16 sps:$4 sm:$0xff]  }
  0x16   :  { %831 = vmatprep.subr.bf16.mxu1 %v906_v21  ;;  %v958_v59 = vld [vmem:[%s1205_s0 + $0xc8] ss:$16 sps:$4 sm:$0xff]   ;;  %v959_v60 = vld [vmem:[%s1205_s0 + $0xe4] ss:$16 sps:$4 sm:$0xff]   ;;  %v961_v61 = vld [vmem:[%s1205_s0 + $0xec] ss:$16 sps:$4 sm:$0xff]  }
  0x17   :  { %v963_v62 = vld [vmem:[%s1205_s0 + $0xe0] ss:$16 sps:$4 sm:$0xff]   ;;  %v964_v63 = vld [vmem:[%s1205_s0 + $0xe8] ss:$16 sps:$4 sm:$0xff]  }
  0x18   :  { %768 = vmatpush3.bf16.msra.mxu0 %v907_v22 }
  0x19   :  { %832 = vmatpush3.bf16.msra.mxu1 %v908_v23  ;;  %769 = vmatprep.subr.bf16.mxu0 %v909_v24 }
  0x1a   :  { %833 = vmatprep.subr.bf16.mxu1 %v910_v25 }
  0x1c   :  { %770 = vmatpush3.bf16.msra.mxu0 %v911_v26 }
  0x1d   :  { %834 = vmatpush3.bf16.msra.mxu1 %v912_v27  ;;  %771 = vmatprep.subr.bf16.mxu0 %v913_v28 }
  0x1e   :  { %835 = vmatprep.subr.bf16.mxu1 %v914_v29 }
  0x20   :  { %772 = vmatpush3.bf16.msra.mxu0 %v915_v30 }
  0x21   :  { %836 = vmatpush3.bf16.msra.mxu1 %v916_v31 }
  0x23   :  { %496 = vmatmul.mubr.bf16.vlgmr.msra.gmra.mrb[0].mxu0 %v917_v32 }
  0x24   :  { %593 = vmatmul.mubr.bf16.vlgmr.msra.gmra.mrb[0].mxu1 %v920_v34  ;;  %503 = vmatprep.mubr.bf16.mxu0 %v923_v36 }
  0x25   :  { %600 = vmatprep.mubr.bf16.mxu1 %v925_v37 }
  0x2b   :  { %504 = vmatmul.mubr.bf16.gmra.mrb[4].mxu0 %v927_v38 }
  0x2c   :  { %601 = vmatmul.mubr.bf16.gmra.mrb[4].mxu1 %v928_v39  ;;  %511 = vmatprep.mubr.bf16.mxu0 %v929_v40 }
  0x2d   :  { %608 = vmatprep.mubr.bf16.mxu1 %v931_v41 }
  0x33   :  { %512 = vmatmul.mubr.bf16.gmra.mrb[8].mxu0 %v933_v42 }
  0x34   :  { %609 = vmatmul.mubr.bf16.gmra.mrb[8].mxu1 %v934_v43  ;;  %519 = vmatprep.mubr.bf16.mxu0 %v935_v44 }
  0x35   :  { %616 = vmatprep.mubr.bf16.mxu1 %v937_v45 }
  0x3b   :  { %520 = vmatmul.mubr.bf16.gmra.mrb[12].mxu0 %v939_v46 }
  0x3c   :  { %617 = vmatmul.mubr.bf16.gmra.mrb[12].mxu1 %v940_v47  ;;  %527 = vmatprep.mubr.bf16.mxu0 %v941_v48 }
  0x3d   :  { %624 = vmatprep.mubr.bf16.mxu1 %v943_v49 }
  0x43   :  { %528 = vmatmul.mubr.bf16.gmra.mrb[16].mxu0 %v945_v50 }
  0x44   :  { %625 = vmatmul.mubr.bf16.gmra.mrb[16].mxu1 %v946_v51  ;;  %535 = vmatprep.mubr.bf16.mxu0 %v947_v52 }
  0x45   :  { %632 = vmatprep.mubr.bf16.mxu1 %v949_v53 }
  0x4b   :  { %536 = vmatmul.mubr.bf16.gmra.mrb[20].mxu0 %v951_v54 }
  0x4c   :  { %633 = vmatmul.mubr.bf16.gmra.mrb[20].mxu1 %v952_v55  ;;  %543 = vmatprep.mubr.bf16.mxu0 %v953_v56 }
  0x4d   :  { %640 = vmatprep.mubr.bf16.mxu1 %v955_v57 }
  0x53   :  { %544 = vmatmul.mubr.bf16.gmra.mrb[24].mxu0 %v957_v58 }
  0x54   :  { %641 = vmatmul.mubr.bf16.gmra.mrb[24].mxu1 %v958_v59  ;;  %551 = vmatprep.mubr.bf16.mxu0 %v959_v60 }
  0x55   :  { %648 = vmatprep.mubr.bf16.mxu1 %v961_v61 }
  0x5b   :  { %552 = vmatmul.mubr.bf16.gmra.mrb[28].mxu0 %v963_v62 }
  0x5c   :  { %649 = vmatmul.mubr.bf16.gmra.mrb[28].mxu1 %v964_v63 }
  0xf6   :  { %v773_v0 = vpop.f32.mrb[0].mxu0 }
  0xf7   :  { %v837_v1 = vpop.f32.mrb[0].mxu1  ;;  %v774_v2 = vpop.f32.mrb[1].mxu0 }
  0xf8   :  { %v775_v3 = vadd.f32 %v774_v2, %v773_v0  ;;  %v838_v4 = vpop.f32.mrb[1].mxu1  ;;  %v776_v5 = vpop.f32.mrb[2].mxu0 }
  0xf9   :  { %v839_v6 = vadd.f32 %v838_v4, %v837_v1  ;;  %v840_v7 = vpop.f32.mrb[2].mxu1  ;;  %v777_v8 = vpop.f32.mrb[3].mxu0 }
  0xfa   :  { %v778_v9 = vadd.f32 %v777_v8, %v776_v5  ;;  %v841_v10 = vpop.f32.mrb[3].mxu1 }
  0xfb   :  { %v1177_v11 = vadd.f32 %v839_v6, %v775_v3  ;;  %v842_v12 = vadd.f32 %v841_v10, %v840_v7 }
  0xfd   :  { %v1179_v13 = vadd.f32 %v842_v12, %v778_v9 }
  0xfe   :  { %v779_v14 = vpop.f32.mrb[4].mxu0 }
  0xff   :  { %v843_v15 = vpop.f32.mrb[4].mxu1  ;;  %v780_v16 = vpop.f32.mrb[5].mxu0 }
 0x100   :  { %v781_v17 = vadd.f32 %v780_v16, %v779_v14  ;;  %v844_v18 = vpop.f32.mrb[5].mxu1  ;;  %v782_v19 = vpop.f32.mrb[6].mxu0 }
 0x101   :  { %v845_v20 = vadd.f32 %v844_v18, %v843_v15  ;;  %v846_v21 = vpop.f32.mrb[6].mxu1  ;;  %v783_v22 = vpop.f32.mrb[7].mxu0 }
 0x102   :  { %v784_v23 = vadd.f32 %v783_v22, %v782_v19  ;;  %v847_v24 = vpop.f32.mrb[7].mxu1 }
 0x103   :  { %v1181_v25 = vadd.f32 %v845_v20, %v781_v17  ;;  %v848_v26 = vadd.f32 %v847_v24, %v846_v21 }
 0x105   :  { %v1183_v27 = vadd.f32 %v848_v26, %v784_v23 }
 0x106   :  { %v785_v28 = vpop.f32.mrb[8].mxu0 }
 0x107   :  { %v849_v29 = vpop.f32.mrb[8].mxu1  ;;  %v786_v30 = vpop.f32.mrb[9].mxu0 }
 0x108   :  { %v787_v31 = vadd.f32 %v786_v30, %v785_v28  ;;  %v850_v32 = vpop.f32.mrb[9].mxu1  ;;  %v788_v33 = vpop.f32.mrb[10].mxu0 }
 0x109   :  { %v851_v34 = vadd.f32 %v850_v32, %v849_v29  ;;  %v852_v35 = vpop.f32.mrb[10].mxu1  ;;  %v789_v36 = vpop.f32.mrb[11].mxu0 }
 0x10a   :  { %v790_v37 = vadd.f32 %v789_v36, %v788_v33  ;;  %v853_v38 = vpop.f32.mrb[11].mxu1 }
 0x10b   :  { %v611_v39 = vadd.f32 %v851_v34, %v787_v31  ;;  %v854_v40 = vadd.f32 %v853_v38, %v852_v35 }
 0x10d   :  { %v657_v41 = vmax.f32 %v1177_v11, %v611_v39  ;;  %v614_v42 = vadd.f32 %v854_v40, %v790_v37 }
 0x10e   :  { %v791_v43 = vpop.f32.mrb[12].mxu0 }
 0x10f   :  { %v660_v44 = vmax.f32 %v1179_v13, %v614_v42  ;;  %v855_v45 = vpop.f32.mrb[12].mxu1  ;;  %v792_v46 = vpop.f32.mrb[13].mxu0 }
 0x110   :  { %v793_v47 = vadd.f32 %v792_v46, %v791_v43  ;;  %v856_v48 = vpop.f32.mrb[13].mxu1  ;;  %v794_v49 = vpop.f32.mrb[14].mxu0 }
 0x111   :  { %v857_v50 = vadd.f32 %v856_v48, %v855_v45  ;;  %v858_v51 = vpop.f32.mrb[14].mxu1  ;;  %v795_v52 = vpop.f32.mrb[15].mxu0 }
 0x112   :  { %v796_v53 = vadd.f32 %v795_v52, %v794_v49  ;;  %v859_v54 = vpop.f32.mrb[15].mxu1 }
 0x113   :  { %v619_v55 = vadd.f32 %v857_v50, %v793_v47  ;;  %v860_v56 = vadd.f32 %v859_v54, %v858_v51 }
 0x115   :  { %v663_v57 = vmax.f32 %v1181_v25, %v619_v55  ;;  %v622_v58 = vadd.f32 %v860_v56, %v796_v53 }
 0x116   :  { %v797_v59 = vpop.f32.mrb[16].mxu0 }
 0x117   :  { %v666_v60 = vmax.f32 %v1183_v27, %v622_v58  ;;  %v861_v61 = vpop.f32.mrb[16].mxu1  ;;  %v798_v62 = vpop.f32.mrb[17].mxu0 }
 0x118   :  { %v799_v63 = vadd.f32 %v798_v62, %v797_v59  ;;  %v862_v0 = vpop.f32.mrb[17].mxu1  ;;  %v800_v1 = vpop.f32.mrb[18].mxu0 }
 0x119   :  { %v863_v2 = vadd.f32 %v862_v0, %v861_v61  ;;  %v864_v3 = vpop.f32.mrb[18].mxu1  ;;  %v801_v4 = vpop.f32.mrb[19].mxu0 }
 0x11a   :  { %v802_v5 = vadd.f32 %v801_v4, %v800_v1  ;;  %v865_v6 = vpop.f32.mrb[19].mxu1 }
 0x11b   :  { %v627_v7 = vadd.f32 %v863_v2, %v799_v63  ;;  %v866_v8 = vadd.f32 %v865_v6, %v864_v3 }
 0x11d   :  { %v658_v9 = vmax.f32 %v657_v41, %v627_v7  ;;  %v630_v10 = vadd.f32 %v866_v8, %v802_v5  ;;  %v756_v41 = vld [vmem:[%s1206_s2] ss:$0 sm:$0xff] }
 0x11e   :  { %v803_v11 = vpop.f32.mrb[20].mxu0 }
 0x11f   :  { %v661_v12 = vmax.f32 %v660_v44, %v630_v10  ;;  %v867_v13 = vpop.f32.mrb[20].mxu1  ;;  %v804_v14 = vpop.f32.mrb[21].mxu0 }
 0x120   :  { %v805_v15 = vadd.f32 %v804_v14, %v803_v11  ;;  %v868_v16 = vpop.f32.mrb[21].mxu1  ;;  %v806_v17 = vpop.f32.mrb[22].mxu0 }
 0x121   :  { %v869_v18 = vadd.f32 %v868_v16, %v867_v13  ;;  %v870_v19 = vpop.f32.mrb[22].mxu1  ;;  %v807_v20 = vpop.f32.mrb[23].mxu0 }
 0x122   :  { %v808_v21 = vadd.f32 %v807_v20, %v806_v17  ;;  %v871_v22 = vpop.f32.mrb[23].mxu1 }
 0x123   :  { %v635_v23 = vadd.f32 %v869_v18, %v805_v15  ;;  %v872_v24 = vadd.f32 %v871_v22, %v870_v19 }
 0x125   :  { %v664_v25 = vmax.f32 %v663_v57, %v635_v23  ;;  %v638_v26 = vadd.f32 %v872_v24, %v808_v21 }
 0x126   :  { %v809_v27 = vpop.f32.mrb[24].mxu0 }
 0x127   :  { %v667_v28 = vmax.f32 %v666_v60, %v638_v26  ;;  %v873_v29 = vpop.f32.mrb[24].mxu1  ;;  %v810_v30 = vpop.f32.mrb[25].mxu0 }
 0x128   :  { %v811_v31 = vadd.f32 %v810_v30, %v809_v27  ;;  %v874_v32 = vpop.f32.mrb[25].mxu1  ;;  %v812_v33 = vpop.f32.mrb[26].mxu0 }
 0x129   :  { %v875_v34 = vadd.f32 %v874_v32, %v873_v29  ;;  %v876_v35 = vpop.f32.mrb[26].mxu1  ;;  %v813_v36 = vpop.f32.mrb[27].mxu0 }
 0x12a   :  { %v814_v37 = vadd.f32 %v813_v36, %v812_v33  ;;  %v877_v38 = vpop.f32.mrb[27].mxu1 }
 0x12b   :  { %v643_v39 = vadd.f32 %v875_v34, %v811_v31  ;;  %v878_v40 = vadd.f32 %v877_v38, %v876_v35 }
 0x12d   :  { %v659_v42 = vmax.f32 %v658_v9, %v643_v39  ;;  %v646_v43 = vadd.f32 %v878_v40, %v814_v37 }
 0x12e   :  { %v815_v44 = vpop.f32.mrb[28].mxu0 }
 0x12f   :  { %v676_v45 = vadd.f32 %v756_v41, %v659_v42  ;;  %v662_v46 = vmax.f32 %v661_v12, %v646_v43  ;;  %v879_v47 = vpop.f32.mrb[28].mxu1  ;;  %v816_v48 = vpop.f32.mrb[29].mxu0 }
 0x130   :  { %v817_v49 = vadd.f32 %v816_v48, %v815_v44  ;;  %v880_v50 = vpop.f32.mrb[29].mxu1  ;;  %v818_v51 = vpop.f32.mrb[30].mxu0 }
 0x131   :  { %v680_v52 = vmax.f32 %v676_v45, 0.0  ;;  %v677_v53 = vadd.f32 %v756_v41, %v662_v46  ;;  %v881_v54 = vadd.f32 %v880_v50, %v879_v47  ;;  %v882_v55 = vpop.f32.mrb[30].mxu1  ;;  %v819_v56 = vpop.f32.mrb[31].mxu0 }
 0x132   :  { %v820_v57 = vadd.f32 %v819_v56, %v818_v51  ;;  %v883_v58 = vpop.f32.mrb[31].mxu1 }
 0x133   :  { %684 = vst [vmem:[%s1207_s3] sm:$0xff] %v680_v52  ;;  %v681_v59 = vmax.f32 %v677_v53, 0.0  ;;  %v651_v60 = vadd.f32 %v881_v54, %v817_v49  ;;  %v884_v61 = vadd.f32 %v883_v58, %v882_v55 }
 0x135   :  { %685 = vst [vmem:[%s1207_s3 + $0x8] sm:$0xff] %v681_v59  ;;  %v665_v62 = vmax.f32 %v664_v25, %v651_v60  ;;  %v654_v63 = vadd.f32 %v884_v61, %v820_v57 }
 0x137   :  { %v678_v0 = vadd.f32 %v756_v41, %v665_v62  ;;  %v668_v1 = vmax.f32 %v667_v28, %v654_v63 }
 0x139   :  { %v682_v2 = vmax.f32 %v678_v0, 0.0  ;;  %v679_v3 = vadd.f32 %v756_v41, %v668_v1 }
 0x13b   :  { %686 = vst [vmem:[%s1207_s3 + $0x10] sm:$0xff] %v682_v2  ;;  %v683_v4 = vmax.f32 %v679_v3, 0.0 }
 0x13d   :  { %687 = vst [vmem:[%s1207_s3 + $0x18] sm:$0xff] %v683_v4 }

// kernel: convnet_forward.5
= control target key start
LH: loop header
LB: loop body
LE: loop exit
PB: predicated region body
PF: predicated region fallthrough
CT: control target
= control target key end

     0   :  { %vm1286_vm0 = vcmask 261120   ;;  %s3418_s1 = inlined_call_operand.vmem [shape: bf16[800,512], index: 1, kind: input, shape index: {}]   ;;  %s3419_s0 = inlined_call_operand.vmem [shape: bf16[16,800], index: 0, kind: input, shape index: {}]   ;;  %s3420_s3 = inlined_call_operand.vmem [shape: bf16[512,128], index: 3, kind: input, shape index: {}]   ;;  %s3421_s2 = inlined_call_operand.vmem [shape: f32[1,512], index: 2, kind: input, shape index: {}]   ;;  %s3422_s4 = inlined_call_operand.vmem [shape: f32[1,128], index: 4, kind: input, shape index: {}]   ;;  %s3423_s5 = inlined_call_operand.vmem [shape: f32[16,128], index: 5, kind: output, shape index: {}]  }
   0x1   :  { %v2316_v0 = vld [vmem:[%s3418_s1 + $0x4] ss:$16 sps:$4 sm:$0xff]   ;;  %v2318_v1 = vld [vmem:[%s3418_s1 + $0xc] ss:$16 sps:$4 sm:$0xff]   ;;  %v2320_v2 = vld [vmem:[%s3418_s1] ss:$16 sps:$4 sm:$0xff]  }
   0x2   :  { %1290 = vmatprep.subr.bf16.mxu0 %v2316_v0  ;;  %v2321_v3 = vld [vmem:[%s3418_s1 + $0x8] ss:$16 sps:$4 sm:$0xff]   ;;  %1462 = vmatprep.subr.bf16.mxu1 %v2318_v1  ;;  %v2322_v4 = vld [vmem:[%s3418_s1 + $0x24] ss:$16 sps:$4 sm:$0xff]   ;;  %v2324_v5 = vld [vmem:[%s3418_s1 + $0x2c] ss:$16 sps:$4 sm:$0xff]  }
   0x3   :  { %1291 = vmatpush1.bf16.msra.mxu0 %v2320_v2  ;;  %1463 = vmatpush1.bf16.msra.mxu1 %v2321_v3  ;;  %v2326_v6 = vld [vmem:[%s3418_s1 + $0x20] ss:$16 sps:$4 sm:$0xff]   ;;  %v2327_v7 = vld [vmem:[%s3418_s1 + $0x28] ss:$16 sps:$4 sm:$0xff]   ;;  %v2328_v8 = vld [vmem:[%s3418_s1 + $0x44] ss:$16 sps:$4 sm:$0xff]  }
   0x4   :  { %1292 = vmatprep.subr.bf16.mxu0 %v2322_v4  ;;  %1464 = vmatprep.subr.bf16.mxu1 %v2324_v5  ;;  %v2330_v9 = vld [vmem:[%s3418_s1 + $0x4c] ss:$16 sps:$4 sm:$0xff]   ;;  %v2332_v10 = vld [vmem:[%s3418_s1 + $0x40] ss:$16 sps:$4 sm:$0xff]   ;;  %v2333_v11 = vld [vmem:[%s3418_s1 + $0x48] ss:$16 sps:$4 sm:$0xff]  }
   0x5   :  { %v2334_v12 = vld [vmem:[%s3418_s1 + $0x64] ss:$16 sps:$4 sm:$0xff]   ;;  %v2336_v13 = vld [vmem:[%s3418_s1 + $0x6c] ss:$16 sps:$4 sm:$0xff]   ;;  %v2338_v14 = vld [vmem:[%s3418_s1 + $0x60] ss:$16 sps:$4 sm:$0xff]  }
   0x6   :  { %v2339_v15 = vld [vmem:[%s3418_s1 + $0x68] ss:$16 sps:$4 sm:$0xff]   ;;  %v2340_v16 = vld [vmem:[%s3418_s1 + $0x84] ss:$16 sps:$4 sm:$0xff]   ;;  %v2342_v17 = vld [vmem:[%s3418_s1 + $0x8c] ss:$16 sps:$4 sm:$0xff]  }
   0x7   :  { %1293 = vmatpush1.bf16.msra.mxu0 %v2326_v6  ;;  %1465 = vmatpush1.bf16.msra.mxu1 %v2327_v7  ;;  %v2344_v18 = vld [vmem:[%s3418_s1 + $0x80] ss:$16 sps:$4 sm:$0xff]   ;;  %v2345_v19 = vld [vmem:[%s3418_s1 + $0x88] ss:$16 sps:$4 sm:$0xff]   ;;  %v2346_v20 = vld [vmem:[%s3418_s1 + $0xa4] ss:$16 sps:$4 sm:$0xff]  }
   0x8   :  { %1294 = vmatprep.subr.bf16.mxu0 %v2328_v8  ;;  %1466 = vmatprep.subr.bf16.mxu1 %v2330_v9  ;;  %v2348_v21 = vld [vmem:[%s3418_s1 + $0xac] ss:$16 sps:$4 sm:$0xff]   ;;  %v2350_v22 = vld [vmem:[%s3418_s1 + $0xa0] ss:$16 sps:$4 sm:$0xff]   ;;  %v2351_v23 = vld [vmem:[%s3418_s1 + $0xa8] ss:$16 sps:$4 sm:$0xff]  }
   0x9   :  { %v2352_v24 = vld [vmem:[%s3418_s1 + $0xc4] ss:$16 sps:$4 sm:$0xff]   ;;  %v2354_v25 = vld [vmem:[%s3418_s1 + $0xcc] ss:$16 sps:$4 sm:$0xff]   ;;  %v2356_v26 = vld [vmem:[%s3418_s1 + $0xc0] ss:$16 sps:$4 sm:$0xff]  }
   0xa   :  { %v2357_v27 = vld [vmem:[%s3418_s1 + $0xc8] ss:$16 sps:$4 sm:$0xff]   ;;  %v2358_v28 = vld [vmem:[%s3418_s1 + $0xe4] ss:$16 sps:$4 sm:$0xff]   ;;  %v2360_v29 = vld [vmem:[%s3418_s1 + $0xec] ss:$16 sps:$4 sm:$0xff]  }
   0xb   :  { %1295 = vmatpush1.bf16.msra.mxu0 %v2332_v10  ;;  %1467 = vmatpush1.bf16.msra.mxu1 %v2333_v11  ;;  %v2362_v30 = vld [vmem:[%s3418_s1 + $0xe0] ss:$16 sps:$4 sm:$0xff]   ;;  %v2363_v31 = vld [vmem:[%s3418_s1 + $0xe8] ss:$16 sps:$4 sm:$0xff]   ;;  %v2364_v32 = vld [vmem:[%s3418_s1 + $0x104] ss:$16 sps:$4 sm:$0xff]  }
   0xc   :  { %1296 = vmatprep.subr.bf16.mxu0 %v2334_v12  ;;  %1468 = vmatprep.subr.bf16.mxu1 %v2336_v13  ;;  %v2366_v33 = vld [vmem:[%s3418_s1 + $0x10c] ss:$16 sps:$4 sm:$0xff]   ;;  %v2368_v34 = vld [vmem:[%s3418_s1 + $0x100] ss:$16 sps:$4 sm:$0xff]   ;;  %v2369_v35 = vld [vmem:[%s3418_s1 + $0x108] ss:$16 sps:$4 sm:$0xff]  }
   0xd   :  { %v2370_v36 = vld [vmem:[%s3418_s1 + $0x124] ss:$16 sps:$4 sm:$0xff]   ;;  %v2372_v37 = vld [vmem:[%s3418_s1 + $0x12c] ss:$16 sps:$4 sm:$0xff]   ;;  %v2374_v38 = vld [vmem:[%s3418_s1 + $0x120] ss:$16 sps:$4 sm:$0xff]  }
   0xe   :  { %v2375_v39 = vld [vmem:[%s3418_s1 + $0x128] ss:$16 sps:$4 sm:$0xff]   ;;  %v2376_v40 = vld [vmem:[%s3418_s1 + $0x144] ss:$16 sps:$4 sm:$0xff]   ;;  %v2378_v41 = vld [vmem:[%s3418_s1 + $0x14c] ss:$16 sps:$4 sm:$0xff]  }
   0xf   :  { %1297 = vmatpush1.bf16.msra.mxu0 %v2338_v14  ;;  %1469 = vmatpush1.bf16.msra.mxu1 %v2339_v15  ;;  %v2380_v42 = vld [vmem:[%s3418_s1 + $0x140] ss:$16 sps:$4 sm:$0xff]   ;;  %v2381_v43 = vld [vmem:[%s3418_s1 + $0x148] ss:$16 sps:$4 sm:$0xff]   ;;  %v2382_v44 = vld [vmem:[%s3418_s1 + $0x164] ss:$16 sps:$4 sm:$0xff]  }
  0x10   :  { %1298 = vmatprep.subr.bf16.mxu0 %v2340_v16  ;;  %1470 = vmatprep.subr.bf16.mxu1 %v2342_v17  ;;  %v2384_v45 = vld [vmem:[%s3418_s1 + $0x16c] ss:$16 sps:$4 sm:$0xff]   ;;  %v2386_v46 = vld [vmem:[%s3418_s1 + $0x160] ss:$16 sps:$4 sm:$0xff]   ;;  %v2387_v47 = vld [vmem:[%s3418_s1 + $0x168] ss:$16 sps:$4 sm:$0xff]  }
  0x11   :  { %v2414_v48 = vld [vmem:[%s3419_s0 + $0x4] ss:$28 sps:$4 sm:$0xff]   ;;  %v2390_v50 = vld [vmem:[%s3418_s1 + $0x18c] ss:$16 sps:$4 sm:$0xff]   ;;  %v2393_v52 = vld [vmem:[%s3418_s1 + $0x188] ss:$16 sps:$4 sm:$0xff]  }
  0x12   :  { %v2388_v49 = vld [vmem:[%s3418_s1 + $0x184] ss:$16 sps:$4 sm:$0xff]   ;;  %1322 = vmatprep.mubr.bf16.mxu0 %v2414_v48  ;;  %1494 = vmatprep.mubr.bf16.mxu1 %v2414_v48  ;;  %v2392_v51 = vld [vmem:[%s3418_s1 + $0x180] ss:$16 sps:$4 sm:$0xff]   ;;  %v2396_v54 = vld [vmem:[%s3418_s1 + $0x1ac] ss:$16 sps:$4 sm:$0xff]  }
  0x13   :  { %1299 = vmatpush1.bf16.msra.mxu0 %v2344_v18  ;;  %1471 = vmatpush1.bf16.msra.mxu1 %v2345_v19  ;;  %v2394_v53 = vld [vmem:[%s3418_s1 + $0x1a4] ss:$16 sps:$4 sm:$0xff]   ;;  %v2398_v55 = vld [vmem:[%s3418_s1 + $0x1a0] ss:$16 sps:$4 sm:$0xff]   ;;  %v2399_v56 = vld [vmem:[%s3418_s1 + $0x1a8] ss:$16 sps:$4 sm:$0xff]  }
  0x14   :  { %1300 = vmatprep.subr.bf16.mxu0 %v2346_v20  ;;  %1472 = vmatprep.subr.bf16.mxu1 %v2348_v21  ;;  %v2400_v57 = vld [vmem:[%s3418_s1 + $0x1c4] ss:$16 sps:$4 sm:$0xff]   ;;  %v2402_v58 = vld [vmem:[%s3418_s1 + $0x1cc] ss:$16 sps:$4 sm:$0xff]   ;;  %v2404_v59 = vld [vmem:[%s3418_s1 + $0x1c0] ss:$16 sps:$4 sm:$0xff]  }
  0x15   :  { %v2405_v60 = vld [vmem:[%s3418_s1 + $0x1c8] ss:$16 sps:$4 sm:$0xff]   ;;  %v2406_v61 = vld [vmem:[%s3418_s1 + $0x1e4] ss:$16 sps:$4 sm:$0xff]   ;;  %v2408_v62 = vld [vmem:[%s3418_s1 + $0x1ec] ss:$16 sps:$4 sm:$0xff]  }
  0x16   :  { %v2410_v63 = vld [vmem:[%s3418_s1 + $0x1e0] ss:$16 sps:$4 sm:$0xff]   ;;  %v2411_v0 = vld [vmem:[%s3418_s1 + $0x1e8] ss:$16 sps:$4 sm:$0xff]   ;;  %v2417_v1 = vld [vmem:[%s3418_s1 + $0x204] ss:$16 sps:$4 sm:$0xff]  }
  0x17   :  { %1301 = vmatpush1.bf16.msra.mxu0 %v2350_v22  ;;  %1473 = vmatpush1.bf16.msra.mxu1 %v2351_v23  ;;  %v2420_v2 = vld [vmem:[%s3418_s1 + $0x20c] ss:$16 sps:$4 sm:$0xff]   ;;  %v2415_v4 = vld [vmem:[%s3418_s1 + $0x200] ss:$16 sps:$4 sm:$0xff]   ;;  %v2418_v5 = vld [vmem:[%s3418_s1 + $0x208] ss:$16 sps:$4 sm:$0xff]  }
  0x18   :  { %1302 = vmatprep.subr.bf16.mxu0 %v2352_v24  ;;  %1474 = vmatprep.subr.bf16.mxu1 %v2354_v25  ;;  %v2412_v3 = vld [vmem:[%s3419_s0] ss:$28 sps:$4 sm:$0xff]   ;;  %v2423_v6 = vld [vmem:[%s3418_s1 + $0x224] ss:$16 sps:$4 sm:$0xff]   ;;  %v2424_v9 = vld [vmem:[%s3418_s1 + $0x228] ss:$16 sps:$4 sm:$0xff]  }
  0x19   :  { %v2426_v7 = vld [vmem:[%s3418_s1 + $0x22c] ss:$16 sps:$4 sm:$0xff]   ;;  %v2421_v8 = vld [vmem:[%s3418_s1 + $0x220] ss:$16 sps:$4 sm:$0xff]   ;;  %v2429_v10 = vld [vmem:[%s3418_s1 + $0x244] ss:$16 sps:$4 sm:$0xff]  }
  0x1a   :  { %v2432_v11 = vld [vmem:[%s3418_s1 + $0x24c] ss:$16 sps:$4 sm:$0xff]   ;;  %v2427_v12 = vld [vmem:[%s3418_s1 + $0x240] ss:$16 sps:$4 sm:$0xff]   ;;  %v2430_v13 = vld [vmem:[%s3418_s1 + $0x248] ss:$16 sps:$4 sm:$0xff]  }
  0x1b   :  { %1303 = vmatpush1.bf16.msra.mxu0 %v2356_v26  ;;  %1475 = vmatpush1.bf16.msra.mxu1 %v2357_v27  ;;  %v2435_v14 = vld [vmem:[%s3418_s1 + $0x264] ss:$16 sps:$4 sm:$0xff]   ;;  %v2438_v15 = vld [vmem:[%s3418_s1 + $0x26c] ss:$16 sps:$4 sm:$0xff]   ;;  %v2433_v16 = vld [vmem:[%s3418_s1 + $0x260] ss:$16 sps:$4 sm:$0xff]  }
  0x1c   :  { %1304 = vmatprep.subr.bf16.mxu0 %v2358_v28  ;;  %1476 = vmatprep.subr.bf16.mxu1 %v2360_v29  ;;  %v2436_v17 = vld [vmem:[%s3418_s1 + $0x268] ss:$16 sps:$4 sm:$0xff]   ;;  %v2441_v18 = vld [vmem:[%s3418_s1 + $0x284] ss:$16 sps:$4 sm:$0xff]   ;;  %v2444_v19 = vld [vmem:[%s3418_s1 + $0x28c] ss:$16 sps:$4 sm:$0xff]  }
  0x1d   :  { %v2439_v20 = vld [vmem:[%s3418_s1 + $0x280] ss:$16 sps:$4 sm:$0xff]   ;;  %v2442_v21 = vld [vmem:[%s3418_s1 + $0x288] ss:$16 sps:$4 sm:$0xff]   ;;  %v2447_v22 = vld [vmem:[%s3418_s1 + $0x2a4] ss:$16 sps:$4 sm:$0xff]  }
  0x1e   :  { %v2450_v23 = vld [vmem:[%s3418_s1 + $0x2ac] ss:$16 sps:$4 sm:$0xff]   ;;  %v2445_v24 = vld [vmem:[%s3418_s1 + $0x2a0] ss:$16 sps:$4 sm:$0xff]   ;;  %v2448_v25 = vld [vmem:[%s3418_s1 + $0x2a8] ss:$16 sps:$4 sm:$0xff]  }
  0x1f   :  { %1305 = vmatpush1.bf16.msra.mxu0 %v2362_v30  ;;  %1477 = vmatpush1.bf16.msra.mxu1 %v2363_v31  ;;  %v2453_v26 = vld [vmem:[%s3418_s1 + $0x2c4] ss:$16 sps:$4 sm:$0xff]   ;;  %v2456_v27 = vld [vmem:[%s3418_s1 + $0x2cc] ss:$16 sps:$4 sm:$0xff]   ;;  %v2451_v28 = vld [vmem:[%s3418_s1 + $0x2c0] ss:$16 sps:$4 sm:$0xff]  }
  0x20   :  { %1306 = vmatprep.subr.bf16.mxu0 %v2364_v32  ;;  %1478 = vmatprep.subr.bf16.mxu1 %v2366_v33  ;;  %v2454_v29 = vld [vmem:[%s3418_s1 + $0x2c8] ss:$16 sps:$4 sm:$0xff]   ;;  %v2459_v31 = vld [vmem:[%s3418_s1 + $0x2e4] ss:$16 sps:$4 sm:$0xff]   ;;  %v2462_v32 = vld [vmem:[%s3418_s1 + $0x2ec] ss:$16 sps:$4 sm:$0xff]  }
  0x21   :  { %v2513_v30 = vld [vmem:[%s3419_s0 + $0xc] ss:$28 sps:$4 sm:$0xff]   ;;  %v2457_v33 = vld [vmem:[%s3418_s1 + $0x2e0] ss:$16 sps:$4 sm:$0xff]  }
  0x22   :  { %v2486_v48 = vld [vmem:[%s3418_s1 + $0x36c] ss:$16 sps:$4 sm:$0xff]  }
  0x23   :  { %1307 = vmatpush1.bf16.msra.mxu0 %v2368_v34  ;;  %1479 = vmatpush1.bf16.msra.mxu1 %v2369_v35  ;;  %v2460_v34 = vld [vmem:[%s3418_s1 + $0x2e8] ss:$16 sps:$4 sm:$0xff]   ;;  %v2465_v35 = vld [vmem:[%s3418_s1 + $0x304] ss:$16 sps:$4 sm:$0xff]  }
  0x24   :  { %1308 = vmatprep.subr.bf16.mxu0 %v2370_v36  ;;  %1480 = vmatprep.subr.bf16.mxu1 %v2372_v37  ;;  %v2468_v36 = vld [vmem:[%s3418_s1 + $0x30c] ss:$16 sps:$4 sm:$0xff]   ;;  %v2463_v37 = vld [vmem:[%s3418_s1 + $0x300] ss:$16 sps:$4 sm:$0xff]  }
  0x27   :  { %1309 = vmatpush1.bf16.msra.mxu0 %v2374_v38  ;;  %1481 = vmatpush1.bf16.msra.mxu1 %v2375_v39  ;;  %v2466_v38 = vld [vmem:[%s3418_s1 + $0x308] ss:$16 sps:$4 sm:$0xff]   ;;  %v2471_v39 = vld [vmem:[%s3418_s1 + $0x324] ss:$16 sps:$4 sm:$0xff]  }
  0x28   :  { %1310 = vmatprep.subr.bf16.mxu0 %v2376_v40  ;;  %1482 = vmatprep.subr.bf16.mxu1 %v2378_v41  ;;  %v2474_v40 = vld [vmem:[%s3418_s1 + $0x32c] ss:$16 sps:$4 sm:$0xff]   ;;  %v2469_v41 = vld [vmem:[%s3418_s1 + $0x320] ss:$16 sps:$4 sm:$0xff]  }
  0x2b   :  { %1311 = vmatpush1.bf16.msra.mxu0 %v2380_v42  ;;  %1483 = vmatpush1.bf16.msra.mxu1 %v2381_v43  ;;  %v2472_v42 = vld [vmem:[%s3418_s1 + $0x328] ss:$16 sps:$4 sm:$0xff]   ;;  %v2477_v43 = vld [vmem:[%s3418_s1 + $0x344] ss:$16 sps:$4 sm:$0xff]  }
  0x2c   :  { %1312 = vmatprep.subr.bf16.mxu0 %v2382_v44  ;;  %1484 = vmatprep.subr.bf16.mxu1 %v2384_v45  ;;  %v2480_v44 = vld [vmem:[%s3418_s1 + $0x34c] ss:$16 sps:$4 sm:$0xff]   ;;  %v2475_v45 = vld [vmem:[%s3418_s1 + $0x340] ss:$16 sps:$4 sm:$0xff]  }
  0x2f   :  { %1313 = vmatpush1.bf16.msra.mxu0 %v2386_v46  ;;  %1485 = vmatpush1.bf16.msra.mxu1 %v2387_v47  ;;  %v2478_v46 = vld [vmem:[%s3418_s1 + $0x348] ss:$16 sps:$4 sm:$0xff]   ;;  %v2483_v47 = vld [vmem:[%s3418_s1 + $0x364] ss:$16 sps:$4 sm:$0xff]  }
  0x30   :  { %1314 = vmatprep.subr.bf16.mxu0 %v2388_v49  ;;  %1486 = vmatprep.subr.bf16.mxu1 %v2390_v50  ;;  %v2481_v49 = vld [vmem:[%s3418_s1 + $0x360] ss:$16 sps:$4 sm:$0xff]   ;;  %v2484_v50 = vld [vmem:[%s3418_s1 + $0x368] ss:$16 sps:$4 sm:$0xff]  }
  0x33   :  { %1315 = vmatpush1.bf16.msra.mxu0 %v2392_v51  ;;  %1487 = vmatpush1.bf16.msra.mxu1 %v2393_v52  ;;  %v2489_v51 = vld [vmem:[%s3418_s1 + $0x384] ss:$16 sps:$4 sm:$0xff]   ;;  %v2492_v52 = vld [vmem:[%s3418_s1 + $0x38c] ss:$16 sps:$4 sm:$0xff]  }
  0x34   :  { %1316 = vmatprep.subr.bf16.mxu0 %v2394_v53  ;;  %1488 = vmatprep.subr.bf16.mxu1 %v2396_v54  ;;  %v2487_v53 = vld [vmem:[%s3418_s1 + $0x380] ss:$16 sps:$4 sm:$0xff]   ;;  %v2490_v54 = vld [vmem:[%s3418_s1 + $0x388] ss:$16 sps:$4 sm:$0xff]  }
  0x37   :  { %1317 = vmatpush1.bf16.msra.mxu0 %v2398_v55  ;;  %1489 = vmatpush1.bf16.msra.mxu1 %v2399_v56  ;;  %v2495_v55 = vld [vmem:[%s3418_s1 + $0x3a4] ss:$16 sps:$4 sm:$0xff]   ;;  %v2498_v56 = vld [vmem:[%s3418_s1 + $0x3ac] ss:$16 sps:$4 sm:$0xff]  }
  0x38   :  { %1318 = vmatprep.subr.bf16.mxu0 %v2400_v57  ;;  %1490 = vmatprep.subr.bf16.mxu1 %v2402_v58  ;;  %v2493_v57 = vld [vmem:[%s3418_s1 + $0x3a0] ss:$16 sps:$4 sm:$0xff]   ;;  %v2496_v58 = vld [vmem:[%s3418_s1 + $0x3a8] ss:$16 sps:$4 sm:$0xff]  }
  0x3b   :  { %1319 = vmatpush1.bf16.msra.mxu0 %v2404_v59  ;;  %1491 = vmatpush1.bf16.msra.mxu1 %v2405_v60  ;;  %v2501_v59 = vld [vmem:[%s3418_s1 + $0x3c4] ss:$16 sps:$4 sm:$0xff]   ;;  %v2504_v60 = vld [vmem:[%s3418_s1 + $0x3cc] ss:$16 sps:$4 sm:$0xff]  }
  0x3c   :  { %1320 = vmatprep.subr.bf16.mxu0 %v2406_v61  ;;  %1492 = vmatprep.subr.bf16.mxu1 %v2408_v62  ;;  %v2499_v61 = vld [vmem:[%s3418_s1 + $0x3c0] ss:$16 sps:$4 sm:$0xff]   ;;  %v2502_v62 = vld [vmem:[%s3418_s1 + $0x3c8] ss:$16 sps:$4 sm:$0xff]  }
  0x3f   :  { %1321 = vmatpush1.bf16.msra.mxu0 %v2410_v63  ;;  %1493 = vmatpush1.bf16.msra.mxu1 %v2411_v0  ;;  %v2507_v63 = vld [vmem:[%s3418_s1 + $0x3e4] ss:$16 sps:$4 sm:$0xff]   ;;  %v2510_v0 = vld [vmem:[%s3418_s1 + $0x3ec] ss:$16 sps:$4 sm:$0xff]  }
  0x40   :  { %1333 = vmatprep.subr.bf16.mxu0 %v2417_v1  ;;  %1505 = vmatprep.subr.bf16.mxu1 %v2420_v2  ;;  %v2505_v1 = vld [vmem:[%s3418_s1 + $0x3e0] ss:$16 sps:$4 sm:$0xff]   ;;  %v2508_v2 = vld [vmem:[%s3418_s1 + $0x3e8] ss:$16 sps:$4 sm:$0xff]  }
  0x42   :  { %1323 = vmatmul.mubr.bf16.vlgmr.msra.gmra.mrb[0].mxu0 %v2412_v3  ;;  %1495 = vmatmul.mubr.bf16.vlgmr.msra.gmra.mrb[0].mxu1 %v2412_v3  ;;  %v2516_v3 = vld [vmem:[%s3418_s1 + $0x404] ss:$16 sps:$4 sm:$0xff]  }
  0x43   :  { %1334 = vmatpush1.bf16.msra.mxu0 %v2415_v4  ;;  %1506 = vmatpush1.bf16.msra.mxu1 %v2418_v5  ;;  %v2519_v4 = vld [vmem:[%s3418_s1 + $0x40c] ss:$16 sps:$4 sm:$0xff]   ;;  %v2511_v5 = vld [vmem:[%s3419_s0 + $0x8] ss:$28 sps:$4 sm:$0xff]  }
  0x44   :  { %1335 = vmatprep.subr.bf16.mxu0 %v2423_v6  ;;  %1507 = vmatprep.subr.bf16.mxu1 %v2426_v7  ;;  %v2514_v6 = vld [vmem:[%s3418_s1 + $0x400] ss:$16 sps:$4 sm:$0xff]   ;;  %v2517_v7 = vld [vmem:[%s3418_s1 + $0x408] ss:$16 sps:$4 sm:$0xff]  }
  0x45   :  { %1365 = vmatprep.mubr.bf16.mxu0 %v2513_v30  ;;  %1537 = vmatprep.mubr.bf16.mxu1 %v2513_v30  ;;  %v2555_v30 = vld [vmem:[%s3418_s1 + $0x4cc] ss:$16 sps:$4 sm:$0xff]  }
  0x47   :  { %1336 = vmatpush1.bf16.msra.mxu0 %v2421_v8  ;;  %1508 = vmatpush1.bf16.msra.mxu1 %v2424_v9  ;;  %v2522_v8 = vld [vmem:[%s3418_s1 + $0x424] ss:$16 sps:$4 sm:$0xff]   ;;  %v2525_v9 = vld [vmem:[%s3418_s1 + $0x42c] ss:$16 sps:$4 sm:$0xff]  }
  0x48   :  { %1337 = vmatprep.subr.bf16.mxu0 %v2429_v10  ;;  %1509 = vmatprep.subr.bf16.mxu1 %v2432_v11  ;;  %v2520_v10 = vld [vmem:[%s3418_s1 + $0x420] ss:$16 sps:$4 sm:$0xff]   ;;  %v2523_v11 = vld [vmem:[%s3418_s1 + $0x428] ss:$16 sps:$4 sm:$0xff]  }
  0x4b   :  { %1338 = vmatpush1.bf16.msra.mxu0 %v2427_v12  ;;  %1510 = vmatpush1.bf16.msra.mxu1 %v2430_v13  ;;  %v2612_v12 = vld [vmem:[%s3419_s0 + $0x14] ss:$28 sps:$4 sm:$0xff]  }
  0x4c   :  { %1339 = vmatprep.subr.bf16.mxu0 %v2435_v14  ;;  %1511 = vmatprep.subr.bf16.mxu1 %v2438_v15  ;;  %v2528_v13 = vld [vmem:[%s3418_s1 + $0x444] ss:$16 sps:$4 sm:$0xff]   ;;  %v2531_v14 = vld [vmem:[%s3418_s1 + $0x44c] ss:$16 sps:$4 sm:$0xff]   ;;  %v2526_v15 = vld [vmem:[%s3418_s1 + $0x440] ss:$16 sps:$4 sm:$0xff]  }
  0x4f   :  { %1340 = vmatpush1.bf16.msra.mxu0 %v2433_v16  ;;  %1512 = vmatpush1.bf16.msra.mxu1 %v2436_v17  ;;  %v2529_v16 = vld [vmem:[%s3418_s1 + $0x448] ss:$16 sps:$4 sm:$0xff]   ;;  %v2534_v17 = vld [vmem:[%s3418_s1 + $0x464] ss:$16 sps:$4 sm:$0xff]  }
  0x50   :  { %1341 = vmatprep.subr.bf16.mxu0 %v2441_v18  ;;  %1513 = vmatprep.subr.bf16.mxu1 %v2444_v19  ;;  %v2537_v18 = vld [vmem:[%s3418_s1 + $0x46c] ss:$16 sps:$4 sm:$0xff]   ;;  %v2532_v19 = vld [vmem:[%s3418_s1 + $0x460] ss:$16 sps:$4 sm:$0xff]  }
  0x53   :  { %1342 = vmatpush1.bf16.msra.mxu0 %v2439_v20  ;;  %1514 = vmatpush1.bf16.msra.mxu1 %v2442_v21  ;;  %v2535_v20 = vld [vmem:[%s3418_s1 + $0x468] ss:$16 sps:$4 sm:$0xff]   ;;  %v2540_v21 = vld [vmem:[%s3418_s1 + $0x484] ss:$16 sps:$4 sm:$0xff]  }
  0x54   :  { %1343 = vmatprep.subr.bf16.mxu0 %v2447_v22  ;;  %1515 = vmatprep.subr.bf16.mxu1 %v2450_v23  ;;  %v2543_v22 = vld [vmem:[%s3418_s1 + $0x48c] ss:$16 sps:$4 sm:$0xff]   ;;  %v2538_v23 = vld [vmem:[%s3418_s1 + $0x480] ss:$16 sps:$4 sm:$0xff]  }
  0x57   :  { %1344 = vmatpush1.bf16.msra.mxu0 %v2445_v24  ;;  %1516 = vmatpush1.bf16.msra.mxu1 %v2448_v25  ;;  %v2541_v24 = vld [vmem:[%s3418_s1 + $0x488] ss:$16 sps:$4 sm:$0xff]   ;;  %v2546_v25 = vld [vmem:[%s3418_s1 + $0x4a4] ss:$16 sps:$4 sm:$0xff]  }
  0x58   :  { %1345 = vmatprep.subr.bf16.mxu0 %v2453_v26  ;;  %1517 = vmatprep.subr.bf16.mxu1 %v2456_v27  ;;  %v2549_v26 = vld [vmem:[%s3418_s1 + $0x4ac] ss:$16 sps:$4 sm:$0xff]   ;;  %v2544_v27 = vld [vmem:[%s3418_s1 + $0x4a0] ss:$16 sps:$4 sm:$0xff]  }
  0x5b   :  { %1346 = vmatpush1.bf16.msra.mxu0 %v2451_v28  ;;  %1518 = vmatpush1.bf16.msra.mxu1 %v2454_v29  ;;  %v2547_v28 = vld [vmem:[%s3418_s1 + $0x4a8] ss:$16 sps:$4 sm:$0xff]   ;;  %v2552_v29 = vld [vmem:[%s3418_s1 + $0x4c4] ss:$16 sps:$4 sm:$0xff]  }
  0x5c   :  { %1347 = vmatprep.subr.bf16.mxu0 %v2459_v31  ;;  %1519 = vmatprep.subr.bf16.mxu1 %v2462_v32  ;;  %v2550_v31 = vld [vmem:[%s3418_s1 + $0x4c0] ss:$16 sps:$4 sm:$0xff]   ;;  %v2553_v32 = vld [vmem:[%s3418_s1 + $0x4c8] ss:$16 sps:$4 sm:$0xff]  }
  0x5f   :  { %1348 = vmatpush1.bf16.msra.mxu0 %v2457_v33  ;;  %1520 = vmatpush1.bf16.msra.mxu1 %v2460_v34  ;;  %v2558_v33 = vld [vmem:[%s3418_s1 + $0x4e4] ss:$16 sps:$4 sm:$0xff]   ;;  %v2561_v34 = vld [vmem:[%s3418_s1 + $0x4ec] ss:$16 sps:$4 sm:$0xff]  }
  0x60   :  { %1349 = vmatprep.subr.bf16.mxu0 %v2465_v35  ;;  %1521 = vmatprep.subr.bf16.mxu1 %v2468_v36  ;;  %v2556_v35 = vld [vmem:[%s3418_s1 + $0x4e0] ss:$16 sps:$4 sm:$0xff]   ;;  %v2559_v36 = vld [vmem:[%s3418_s1 + $0x4e8] ss:$16 sps:$4 sm:$0xff]  }
  0x63   :  { %1350 = vmatpush1.bf16.msra.mxu0 %v2463_v37  ;;  %1522 = vmatpush1.bf16.msra.mxu1 %v2466_v38  ;;  %v2564_v37 = vld [vmem:[%s3418_s1 + $0x504] ss:$16 sps:$4 sm:$0xff]   ;;  %v2567_v38 = vld [vmem:[%s3418_s1 + $0x50c] ss:$16 sps:$4 sm:$0xff]  }
  0x64   :  { %1351 = vmatprep.subr.bf16.mxu0 %v2471_v39  ;;  %1523 = vmatprep.subr.bf16.mxu1 %v2474_v40  ;;  %v2562_v39 = vld [vmem:[%s3418_s1 + $0x500] ss:$16 sps:$4 sm:$0xff]   ;;  %v2565_v40 = vld [vmem:[%s3418_s1 + $0x508] ss:$16 sps:$4 sm:$0xff]  }
  0x67   :  { %1352 = vmatpush1.bf16.msra.mxu0 %v2469_v41  ;;  %1524 = vmatpush1.bf16.msra.mxu1 %v2472_v42  ;;  %v2570_v41 = vld [vmem:[%s3418_s1 + $0x524] ss:$16 sps:$4 sm:$0xff]   ;;  %v2573_v42 = vld [vmem:[%s3418_s1 + $0x52c] ss:$16 sps:$4 sm:$0xff]  }
  0x68   :  { %1353 = vmatprep.subr.bf16.mxu0 %v2477_v43  ;;  %1525 = vmatprep.subr.bf16.mxu1 %v2480_v44  ;;  %v2568_v43 = vld [vmem:[%s3418_s1 + $0x520] ss:$16 sps:$4 sm:$0xff]   ;;  %v2571_v44 = vld [vmem:[%s3418_s1 + $0x528] ss:$16 sps:$4 sm:$0xff]  }
  0x6b   :  { %1354 = vmatpush1.bf16.msra.mxu0 %v2475_v45  ;;  %1526 = vmatpush1.bf16.msra.mxu1 %v2478_v46  ;;  %v2576_v45 = vld [vmem:[%s3418_s1 + $0x544] ss:$16 sps:$4 sm:$0xff]   ;;  %v2579_v46 = vld [vmem:[%s3418_s1 + $0x54c] ss:$16 sps:$4 sm:$0xff]  }
  0x6c   :  { %1355 = vmatprep.subr.bf16.mxu0 %v2483_v47  ;;  %1527 = vmatprep.subr.bf16.mxu1 %v2486_v48  ;;  %v2574_v47 = vld [vmem:[%s3418_s1 + $0x540] ss:$16 sps:$4 sm:$0xff]   ;;  %v2577_v48 = vld [vmem:[%s3418_s1 + $0x548] ss:$16 sps:$4 sm:$0xff]  }
  0x6f   :  { %1356 = vmatpush1.bf16.msra.mxu0 %v2481_v49  ;;  %1528 = vmatpush1.bf16.msra.mxu1 %v2484_v50  ;;  %v2582_v49 = vld [vmem:[%s3418_s1 + $0x564] ss:$16 sps:$4 sm:$0xff]   ;;  %v2585_v50 = vld [vmem:[%s3418_s1 + $0x56c] ss:$16 sps:$4 sm:$0xff]  }
  0x70   :  { %1357 = vmatprep.subr.bf16.mxu0 %v2489_v51  ;;  %1529 = vmatprep.subr.bf16.mxu1 %v2492_v52  ;;  %v2580_v51 = vld [vmem:[%s3418_s1 + $0x560] ss:$16 sps:$4 sm:$0xff]   ;;  %v2583_v52 = vld [vmem:[%s3418_s1 + $0x568] ss:$16 sps:$4 sm:$0xff]  }
  0x73   :  { %1358 = vmatpush1.bf16.msra.mxu0 %v2487_v53  ;;  %1530 = vmatpush1.bf16.msra.mxu1 %v2490_v54  ;;  %v2588_v53 = vld [vmem:[%s3418_s1 + $0x584] ss:$16 sps:$4 sm:$0xff]   ;;  %v2591_v54 = vld [vmem:[%s3418_s1 + $0x58c] ss:$16 sps:$4 sm:$0xff]  }
  0x74   :  { %1359 = vmatprep.subr.bf16.mxu0 %v2495_v55  ;;  %1531 = vmatprep.subr.bf16.mxu1 %v2498_v56  ;;  %v2586_v55 = vld [vmem:[%s3418_s1 + $0x580] ss:$16 sps:$4 sm:$0xff]   ;;  %v2589_v56 = vld [vmem:[%s3418_s1 + $0x588] ss:$16 sps:$4 sm:$0xff]  }
  0x77   :  { %1360 = vmatpush1.bf16.msra.mxu0 %v2493_v57  ;;  %1532 = vmatpush1.bf16.msra.mxu1 %v2496_v58  ;;  %v2594_v57 = vld [vmem:[%s3418_s1 + $0x5a4] ss:$16 sps:$4 sm:$0xff]   ;;  %v2597_v58 = vld [vmem:[%s3418_s1 + $0x5ac] ss:$16 sps:$4 sm:$0xff]  }
  0x78   :  { %1361 = vmatprep.subr.bf16.mxu0 %v2501_v59  ;;  %1533 = vmatprep.subr.bf16.mxu1 %v2504_v60  ;;  %v2592_v59 = vld [vmem:[%s3418_s1 + $0x5a0] ss:$16 sps:$4 sm:$0xff]   ;;  %v2595_v60 = vld [vmem:[%s3418_s1 + $0x5a8] ss:$16 sps:$4 sm:$0xff]  }
  0x7b   :  { %1362 = vmatpush1.bf16.msra.mxu0 %v2499_v61  ;;  %1534 = vmatpush1.bf16.msra.mxu1 %v2502_v62  ;;  %v2600_v61 = vld [vmem:[%s3418_s1 + $0x5c4] ss:$16 sps:$4 sm:$0xff]   ;;  %v2603_v62 = vld [vmem:[%s3418_s1 + $0x5cc] ss:$16 sps:$4 sm:$0xff]  }
  0x7c   :  { %1363 = vmatprep.subr.bf16.mxu0 %v2507_v63  ;;  %1535 = vmatprep.subr.bf16.mxu1 %v2510_v0  ;;  %v2598_v63 = vld [vmem:[%s3418_s1 + $0x5c0] ss:$16 sps:$4 sm:$0xff]   ;;  %v2601_v0 = vld [vmem:[%s3418_s1 + $0x5c8] ss:$16 sps:$4 sm:$0xff]  }
  0x7f   :  { %1364 = vmatpush1.bf16.msra.mxu0 %v2505_v1  ;;  %1536 = vmatpush1.bf16.msra.mxu1 %v2508_v2  ;;  %v2606_v1 = vld [vmem:[%s3418_s1 + $0x5e4] ss:$16 sps:$4 sm:$0xff]   ;;  %v2609_v2 = vld [vmem:[%s3418_s1 + $0x5ec] ss:$16 sps:$4 sm:$0xff]  }
  0x80   :  { %1376 = vmatprep.subr.bf16.mxu0 %v2516_v3  ;;  %1548 = vmatprep.subr.bf16.mxu1 %v2519_v4  ;;  %v2604_v3 = vld [vmem:[%s3418_s1 + $0x5e0] ss:$16 sps:$4 sm:$0xff]   ;;  %v2607_v4 = vld [vmem:[%s3418_s1 + $0x5e8] ss:$16 sps:$4 sm:$0xff]  }
  0x82   :  { %1366 = vmatmul.mubr.bf16.vlgmr.msra.gmra.mrb[0].mxu0 %v2511_v5  ;;  %1538 = vmatmul.mubr.bf16.vlgmr.msra.gmra.mrb[0].mxu1 %v2511_v5  ;;  %v2615_v5 = vld [vmem:[%s3418_s1 + $0x604] ss:$16 sps:$4 sm:$0xff]  }
  0x83   :  { %1377 = vmatpush1.bf16.msra.mxu0 %v2514_v6  ;;  %1549 = vmatpush1.bf16.msra.mxu1 %v2517_v7  ;;  %v2618_v6 = vld [vmem:[%s3418_s1 + $0x60c] ss:$16 sps:$4 sm:$0xff]  }
  0x84   :  { %1378 = vmatprep.subr.bf16.mxu0 %v2522_v8  ;;  %1550 = vmatprep.subr.bf16.mxu1 %v2525_v9  ;;  %v2610_v7 = vld [vmem:[%s3419_s0 + $0x10] ss:$28 sps:$4 sm:$0xff]   ;;  %v2616_v9 = vld [vmem:[%s3418_s1 + $0x608] ss:$16 sps:$4 sm:$0xff]  }
  0x85   :  { %1408 = vmatprep.mubr.bf16.mxu0 %v2612_v12  ;;  %1580 = vmatprep.mubr.bf16.mxu1 %v2612_v12  ;;  %v2613_v8 = vld [vmem:[%s3418_s1 + $0x600] ss:$16 sps:$4 sm:$0xff]  }
  0x86   :  { %v2619_v12 = vld [vmem:[%s3418_s1 + $0x620] ss:$16 sps:$4 sm:$0xff]  }
  0x87   :  { %1379 = vmatpush1.bf16.msra.mxu0 %v2520_v10  ;;  %1551 = vmatpush1.bf16.msra.mxu1 %v2523_v11  ;;  %v2621_v10 = vld [vmem:[%s3418_s1 + $0x624] ss:$16 sps:$4 sm:$0xff]   ;;  %v2624_v11 = vld [vmem:[%s3418_s1 + $0x62c] ss:$16 sps:$4 sm:$0xff]  }
  0x88   :  { %1380 = vmatprep.subr.bf16.mxu0 %v2528_v13  ;;  %1552 = vmatprep.subr.bf16.mxu1 %v2531_v14  ;;  %v2622_v13 = vld [vmem:[%s3418_s1 + $0x628] ss:$16 sps:$4 sm:$0xff]   ;;  %v2626_v14 = vld [vmem:[%s3420_s3 + $0x40] sm:$0xff]  }
  0x8b   :  { %1381 = vmatpush1.bf16.msra.mxu0 %v2526_v15  ;;  %1553 = vmatpush1.bf16.msra.mxu1 %v2529_v16  ;;  %v2627_v15 = vld [vmem:[%s3420_s3 + $0xc0] sm:$0xff]   ;;  %v2658_v16 = vmov 0  }
  0x8c   :  { %1382 = vmatprep.subr.bf16.mxu0 %v2534_v17  ;;  %1554 = vmatprep.subr.bf16.mxu1 %v2537_v18  ;;  %v2625_v17 = vld [vmem:[%s3419_s0 + $0x18] ss:$28 sps:$4 sm:$0xff]   ;;  %v2628_v18 = vld [vmem:[%s3420_s3] sm:$0xff]  }
  0x8f   :  { %1383 = vmatpush1.bf16.msra.mxu0 %v2532_v19  ;;  %1555 = vmatpush1.bf16.msra.mxu1 %v2535_v20  ;;  %v2629_v19 = vld [vmem:[%s3420_s3 + $0x80] sm:$0xff]   ;;  %v2630_v20 = vld [vmem:[%s3420_s3 + $0x48] sm:$0xff]  }
  0x90   :  { %1384 = vmatprep.subr.bf16.mxu0 %v2540_v21  ;;  %1556 = vmatprep.subr.bf16.mxu1 %v2543_v22  ;;  %v2631_v21 = vld [vmem:[%s3420_s3 + $0xc8] sm:$0xff]  }
  0x91   :  { %v2632_v22 = vld [vmem:[%s3420_s3 + $0x8] sm:$0xff]  }
  0x93   :  { %1385 = vmatpush1.bf16.msra.mxu0 %v2538_v23  ;;  %1557 = vmatpush1.bf16.msra.mxu1 %v2541_v24  ;;  %v2633_v23 = vld [vmem:[%s3420_s3 + $0x88] sm:$0xff]   ;;  %v2634_v24 = vld [vmem:[%s3420_s3 + $0x50] sm:$0xff]  }
  0x94   :  { %1386 = vmatprep.subr.bf16.mxu0 %v2546_v25  ;;  %1558 = vmatprep.subr.bf16.mxu1 %v2549_v26  ;;  %v2635_v25 = vld [vmem:[%s3420_s3 + $0xd0] sm:$0xff]  }
  0x95   :  { %v2636_v26 = vld [vmem:[%s3420_s3 + $0x10] sm:$0xff]  }
  0x97   :  { %1387 = vmatpush1.bf16.msra.mxu0 %v2544_v27  ;;  %1559 = vmatpush1.bf16.msra.mxu1 %v2547_v28  ;;  %v2637_v27 = vld [vmem:[%s3420_s3 + $0x90] sm:$0xff]   ;;  %v2638_v28 = vld [vmem:[%s3420_s3 + $0x58] sm:$0xff]  }
  0x98   :  { %1388 = vmatprep.subr.bf16.mxu0 %v2552_v29  ;;  %1560 = vmatprep.subr.bf16.mxu1 %v2555_v30  ;;  %v2639_v29 = vld [vmem:[%s3420_s3 + $0xd8] sm:$0xff]  }
  0x99   :  { %v2640_v30 = vld [vmem:[%s3420_s3 + $0x18] sm:$0xff]  }
  0x9b   :  { %1389 = vmatpush1.bf16.msra.mxu0 %v2550_v31  ;;  %1561 = vmatpush1.bf16.msra.mxu1 %v2553_v32  ;;  %v2641_v31 = vld [vmem:[%s3420_s3 + $0x98] sm:$0xff]   ;;  %v2642_v32 = vld [vmem:[%s3420_s3 + $0x60] sm:$0xff]  }
  0x9c   :  { %1390 = vmatprep.subr.bf16.mxu0 %v2558_v33  ;;  %1562 = vmatprep.subr.bf16.mxu1 %v2561_v34  ;;  %v2643_v33 = vld [vmem:[%s3420_s3 + $0xe0] sm:$0xff]  }
  0x9d   :  { %v2644_v34 = vld [vmem:[%s3420_s3 + $0x20] sm:$0xff]  }
  0x9f   :  { %1391 = vmatpush1.bf16.msra.mxu0 %v2556_v35  ;;  %1563 = vmatpush1.bf16.msra.mxu1 %v2559_v36  ;;  %v2645_v35 = vld [vmem:[%s3420_s3 + $0xa0] sm:$0xff]   ;;  %v2646_v36 = vld [vmem:[%s3420_s3 + $0x68] sm:$0xff]  }
  0xa0   :  { %1392 = vmatprep.subr.bf16.mxu0 %v2564_v37  ;;  %1564 = vmatprep.subr.bf16.mxu1 %v2567_v38  ;;  %v2647_v37 = vld [vmem:[%s3420_s3 + $0xe8] sm:$0xff]  }
  0xa1   :  { %v2648_v38 = vld [vmem:[%s3420_s3 + $0x28] sm:$0xff]  }
  0xa3   :  { %1393 = vmatpush1.bf16.msra.mxu0 %v2562_v39  ;;  %1565 = vmatpush1.bf16.msra.mxu1 %v2565_v40  ;;  %v2649_v39 = vld [vmem:[%s3420_s3 + $0xa8] sm:$0xff]   ;;  %v2650_v40 = vld [vmem:[%s3420_s3 + $0x70] sm:$0xff]  }
  0xa4   :  { %1394 = vmatprep.subr.bf16.mxu0 %v2570_v41  ;;  %1566 = vmatprep.subr.bf16.mxu1 %v2573_v42  ;;  %v2651_v41 = vld [vmem:[%s3420_s3 + $0xf0] sm:$0xff]  }
  0xa5   :  { %v2652_v42 = vld [vmem:[%s3420_s3 + $0x30] sm:$0xff]  }
  0xa7   :  { %1395 = vmatpush1.bf16.msra.mxu0 %v2568_v43  ;;  %1567 = vmatpush1.bf16.msra.mxu1 %v2571_v44  ;;  %v2653_v43 = vld [vmem:[%s3420_s3 + $0xb0] sm:$0xff]   ;;  %v2654_v44 = vld [vmem:[%s3420_s3 + $0x78] sm:$0xff]  }
  0xa8   :  { %1396 = vmatprep.subr.bf16.mxu0 %v2576_v45  ;;  %1568 = vmatprep.subr.bf16.mxu1 %v2579_v46  ;;  %v2655_v45 = vld [vmem:[%s3420_s3 + $0xf8] sm:$0xff]  }
  0xa9   :  { %v2656_v46 = vld [vmem:[%s3420_s3 + $0x38] sm:$0xff]  }
  0xab   :  { %1397 = vmatpush1.bf16.msra.mxu0 %v2574_v47  ;;  %1569 = vmatpush1.bf16.msra.mxu1 %v2577_v48  ;;  %v2657_v47 = vld [vmem:[%s3420_s3 + $0xb8] sm:$0xff]   ;;  %v231_v48 = vlaneseq }
  0xac   :  { %1398 = vmatprep.subr.bf16.mxu0 %v2582_v49  ;;  %1570 = vmatprep.subr.bf16.mxu1 %v2585_v50 }
  0xad   :  { %v232_v49 = vshrl.u32 %v231_v48, 7 }
  0xaf   :  { %1399 = vmatpush1.bf16.msra.mxu0 %v2580_v51  ;;  %1571 = vmatpush1.bf16.msra.mxu1 %v2583_v52  ;;  %v233_v50 = vsub.s32 0, %v232_v49  ;;  %v241_v51 = vsub.s32 2, %v232_v49  ;;  %v229_v52 = vld [vmem:[%s3421_s2] sm:$0xf] }
  0xb0   :  { %1400 = vmatprep.subr.bf16.mxu0 %v2588_v53  ;;  %1572 = vmatprep.subr.bf16.mxu1 %v2591_v54  ;;  %v237_v53 = vsub.s32 1, %v232_v49  ;;  %v245_v54 = vsub.s32 3, %v232_v49 }
  0xb3   :  { %1401 = vmatpush1.bf16.msra.mxu0 %v2586_v55  ;;  %1573 = vmatpush1.bf16.msra.mxu1 %v2589_v56  ;;  %v234_v55 = vrot.slane %v229_v52, %v233_v50  ;;  %v242_v56 = vrot.slane %v229_v52, %v241_v51 }
  0xb4   :  { %1402 = vmatprep.subr.bf16.mxu0 %v2594_v57  ;;  %1574 = vmatprep.subr.bf16.mxu1 %v2597_v58  ;;  %v238_v57 = vrot.slane %v229_v52, %v237_v53  ;;  %v246_v58 = vrot.slane %v229_v52, %v245_v54 }
  0xb7   :  { %1403 = vmatpush1.bf16.msra.mxu0 %v2592_v59  ;;  %1575 = vmatpush1.bf16.msra.mxu1 %v2595_v60 }
  0xb8   :  { %1404 = vmatprep.subr.bf16.mxu0 %v2600_v61  ;;  %1576 = vmatprep.subr.bf16.mxu1 %v2603_v62 }
  0xbb   :  { %1405 = vmatpush1.bf16.msra.mxu0 %v2598_v63  ;;  %1577 = vmatpush1.bf16.msra.mxu1 %v2601_v0 }
  0xbc   :  { %1406 = vmatprep.subr.bf16.mxu0 %v2606_v1  ;;  %1578 = vmatprep.subr.bf16.mxu1 %v2609_v2 }
  0xbf   :  { %1407 = vmatpush1.bf16.msra.mxu0 %v2604_v3  ;;  %1579 = vmatpush1.bf16.msra.mxu1 %v2607_v4 }
  0xc0   :  { %1419 = vmatprep.subr.bf16.mxu0 %v2615_v5  ;;  %1591 = vmatprep.subr.bf16.mxu1 %v2618_v6 }
  0xc2   :  { %1409 = vmatmul.mubr.bf16.vlgmr.msra.gmra.mrb[0].mxu0 %v2610_v7  ;;  %1581 = vmatmul.mubr.bf16.vlgmr.msra.gmra.mrb[0].mxu1 %v2610_v7 }
  0xc3   :  { %1420 = vmatpush1.bf16.msra.mxu0 %v2613_v8  ;;  %1592 = vmatpush1.bf16.msra.mxu1 %v2616_v9 }
  0xc4   :  { %1421 = vmatprep.subr.bf16.mxu0 %v2621_v10  ;;  %1593 = vmatprep.subr.bf16.mxu1 %v2624_v11 }
  0xc5   :  { %1451 = vmatprep.mubr.bf16.mxu0 %v2658_v16  ;;  %1623 = vmatprep.mubr.bf16.mxu1 %v2658_v16 }
  0xc7   :  { %1422 = vmatpush1.bf16.msra.mxu0 %v2619_v12  ;;  %1594 = vmatpush1.bf16.msra.mxu1 %v2622_v13 }
  0xc8   :  { %2239 = vmatprep.subr.bf16.mxu0 %v2626_v14  ;;  %2261 = vmatprep.subr.bf16.mxu1 %v2627_v15 }
  0xce   :  { %2204 = vmatmul.mubr.msk.bf16.vlgmr.msra.gmra.mrb[0].mxu0 %vm1286_vm0, %v2625_v17  ;;  %2205 = vmatmul.mubr.msk.bf16.vlgmr.msra.gmra.mrb[0].mxu1 %vm1286_vm0, %v2625_v17 }
  0xcf   :  { %2240 = vmatpush3.bf16.msra.mxu0 %v2628_v18  ;;  %2262 = vmatpush3.bf16.msra.mxu1 %v2629_v19 }
  0xd0   :  { %2241 = vmatprep.subr.bf16.mxu0 %v2630_v20  ;;  %2263 = vmatprep.subr.bf16.mxu1 %v2631_v21 }
  0xd3   :  { %2242 = vmatpush3.bf16.msra.mxu0 %v2632_v22  ;;  %2264 = vmatpush3.bf16.msra.mxu1 %v2633_v23 }
  0xd4   :  { %2243 = vmatprep.subr.bf16.mxu0 %v2634_v24  ;;  %2265 = vmatprep.subr.bf16.mxu1 %v2635_v25  ;;  %v2206_v25 = vld [vmem:[%s3422_s4] ss:$0 sm:$0xff] }
  0xd7   :  { %2244 = vmatpush3.bf16.msra.mxu0 %v2636_v26  ;;  %2266 = vmatpush3.bf16.msra.mxu1 %v2637_v27 }
  0xd8   :  { %2245 = vmatprep.subr.bf16.mxu0 %v2638_v28  ;;  %2267 = vmatprep.subr.bf16.mxu1 %v2639_v29 }
  0xdb   :  { %2246 = vmatpush3.bf16.msra.mxu0 %v2640_v30  ;;  %2268 = vmatpush3.bf16.msra.mxu1 %v2641_v31 }
  0xdc   :  { %2247 = vmatprep.subr.bf16.mxu0 %v2642_v32  ;;  %2269 = vmatprep.subr.bf16.mxu1 %v2643_v33 }
  0xdf   :  { %2248 = vmatpush3.bf16.msra.mxu0 %v2644_v34  ;;  %2270 = vmatpush3.bf16.msra.mxu1 %v2645_v35 }
  0xe0   :  { %2249 = vmatprep.subr.bf16.mxu0 %v2646_v36  ;;  %2271 = vmatprep.subr.bf16.mxu1 %v2647_v37 }
  0xe3   :  { %2250 = vmatpush3.bf16.msra.mxu0 %v2648_v38  ;;  %2272 = vmatpush3.bf16.msra.mxu1 %v2649_v39 }
  0xe4   :  { %2251 = vmatprep.subr.bf16.mxu0 %v2650_v40  ;;  %2273 = vmatprep.subr.bf16.mxu1 %v2651_v41 }
  0xe7   :  { %2252 = vmatpush3.bf16.msra.mxu0 %v2652_v42  ;;  %2274 = vmatpush3.bf16.msra.mxu1 %v2653_v43 }
  0xe8   :  { %2253 = vmatprep.subr.bf16.mxu0 %v2654_v44  ;;  %2275 = vmatprep.subr.bf16.mxu1 %v2655_v45 }
  0xeb   :  { %2254 = vmatpush3.bf16.msra.mxu0 %v2656_v46  ;;  %2276 = vmatpush3.bf16.msra.mxu1 %v2657_v47 }
 0x1a1   :  { %v1453_v59 = vpop.f32.mrb[0].mxu0  ;;  %v1625_v60 = vpop.f32.mrb[0].mxu1 }
 0x1a2   :  { %v2283_v61 = vadd.f32 %v1453_v59, %v234_v55  ;;  %v2287_v62 = vadd.f32 %v1625_v60, %v242_v56  ;;  %v1455_v63 = vpop.f32.mrb[1].mxu0  ;;  %v1627_v0 = vpop.f32.mrb[1].mxu1 }
 0x1a3   :  { %v2284_v1 = vadd.f32 %v1455_v63, %v238_v57  ;;  %v2288_v2 = vadd.f32 %v1627_v0, %v246_v58  ;;  %v1457_v3 = vpop.f32.mrb[2].mxu0  ;;  %v1629_v4 = vpop.f32.mrb[2].mxu1 }
 0x1a4   :  { %v2285_v5 = vadd.f32 %v1457_v3, %v234_v55  ;;  %v2289_v6 = vadd.f32 %v1629_v4, %v242_v56  ;;  %v1459_v7 = vpop.f32.mrb[3].mxu0  ;;  %v1631_v8 = vpop.f32.mrb[3].mxu1  ;;  %v1634_v11 = vmax.f32 %v2283_v61, 0.0  ;;  %v1636_v12 = vmax.f32 %v2287_v62, 0.0 }
 0x1a5   :  { %v2286_v9 = vadd.f32 %v1459_v7, %v238_v57  ;;  %v2290_v10 = vadd.f32 %v1631_v8, %v246_v58  ;;  %v1635_v15 = vmax.f32 %v2284_v1, 0.0  ;;  %v1637_v16 = vmax.f32 %v2288_v2, 0.0 }
 0x1a6   :  { %v1638_v13 = vmax.f32 %v2285_v5, 0.0  ;;  %v1640_v14 = vmax.f32 %v2289_v6, 0.0 }
 0x1a7   :  { %v1639_v17 = vmax.f32 %v2286_v9, 0.0  ;;  %v1641_v18 = vmax.f32 %v2290_v10, 0.0 }
 0x1a8   :  { %v1642_v19 = vpack.c.bf16 %v1638_v13, %v1634_v11  ;;  %v1644_v20 = vpack.c.bf16 %v1640_v14, %v1636_v12 }
 0x1a9   :  { %v1643_v21 = vpack.c.bf16 %v1639_v17, %v1635_v15  ;;  %v1645_v22 = vpack.c.bf16 %v1641_v18, %v1637_v16 }
 0x1ab   :  { %1941 = vmatprep.mubr.bf16.mxu0 %v1643_v21  ;;  %1982 = vmatprep.mubr.bf16.mxu1 %v1645_v22 }
 0x1ac   :  { %1942 = vmatmul.mubr.bf16.vlgmr.msra.gmra.mrb[4].mxu0 %v1642_v19  ;;  %1983 = vmatmul.mubr.bf16.vlgmr.msra.gmra.mrb[4].mxu1 %v1644_v20 }
 0x27f   :  { %v2255_v23 = vpop.f32.mrb[4].mxu0  ;;  %v2277_v24 = vpop.f32.mrb[4].mxu1 }
 0x280   :  { %v2256_v26 = vpop.f32.mrb[5].mxu0  ;;  %v2278_v27 = vpop.f32.mrb[5].mxu1 }
 0x281   :  { %v2257_v28 = vadd.f32 %v2256_v26, %v2255_v23  ;;  %v2279_v29 = vadd.f32 %v2278_v27, %v2277_v24  ;;  %v2258_v30 = vpop.f32.mrb[6].mxu0  ;;  %v2280_v31 = vpop.f32.mrb[6].mxu1 }
 0x282   :  { %v2259_v32 = vpop.f32.mrb[7].mxu0  ;;  %v2281_v33 = vpop.f32.mrb[7].mxu1 }
 0x283   :  { %v1944_v34 = vadd.f32 %v2257_v28, %v2206_v25  ;;  %v2260_v35 = vadd.f32 %v2259_v32, %v2258_v30  ;;  %v2282_v36 = vadd.f32 %v2281_v33, %v2280_v31 }
 0x285   :  { %v1985_v37 = vadd.f32 %v2279_v29, %v1944_v34  ;;  %v1947_v38 = vadd.f32 %v2260_v35, %v2206_v25 }
 0x287   :  { %1991 = vst [vmem:[%s3423_s5] sm:$0xff] %v1985_v37  ;;  %v1988_v39 = vadd.f32 %v2282_v36, %v1947_v38 }
 0x289   :  { %1992 = vst [vmem:[%s3423_s5 + $0x8] sm:$0xff] %v1988_v39 }

</bundles_post_ra>
